<compile_context>
chip_gen: v6e
topology: v6e:2x2x1
jax: 0.10.0
libtpu: 0.0.40
codegen_flags: <defaults>
</compile_context>

<pallas_src>
import functools

import numpy as np
import jax
import jax.numpy as jnp
from jax import lax
from jax.experimental import pallas as pl
from jax.experimental.pallas import tpu as pltpu

FEATURE_DIM = 2048      # Inception-v3 pooled feature width (fc replaced by Identity)
POOL = 8                # surrogate encoder pooling grid
INCEPTION_SIZE = 299    # F.interpolate target size in the reference module


# --------------------------------------------------------------------------
# Kernel 1: fused surrogate encoder   feats = (x * row_scale) @ M + bias
#   x: (2B, C*H*W) flattened images, M: combined resize+pool+projection matrix
# --------------------------------------------------------------------------
def _encoder_kernel(x_ref, scale_ref, w_ref, b_ref, o_ref):
    x = x_ref[...] * scale_ref[...]                                   # (2B, K)
    o_ref[...] = (
        jnp.dot(x, w_ref[...], preferred_element_type=jnp.float32) + b_ref[...]
    ).astype(o_ref.dtype)


def encoder_linear(x, scale, w, b, tn=1024):
    Bt, K = x.shape
    _, N = w.shape
    assert N % tn == 0
    b2 = b.reshape(1, N)
    return pl.pallas_call(
        _encoder_kernel,
        out_shape=jax.ShapeDtypeStruct((Bt, N), jnp.float32),
        grid_spec=pltpu.PrefetchScalarGridSpec(
            num_scalar_prefetch=0,
            grid=(N // tn,),
            in_specs=[
                pl.BlockSpec((Bt, K), lambda j: (0, 0)),
                pl.BlockSpec((Bt, 1), lambda j: (0, 0)),
                pl.BlockSpec((K, tn), lambda j: (0, j)),
                pl.BlockSpec((1, tn), lambda j: (0, j)),
            ],
            out_specs=pl.BlockSpec((Bt, tn), lambda j: (0, j)),
        ),
        compiler_params=pltpu.CompilerParams(dimension_semantics=("parallel",)),
    )(x, scale, w, b2)


# --------------------------------------------------------------------------
# Kernel 2: batched covariance  sigma[g] = Xc[g]^T @ Xc[g] / (N - 1)
#   (torch.cov(X.T) semantics); gen and real sigmas in one pallas_call.
# --------------------------------------------------------------------------
def _cov_kernel(inv_nm1, xa_ref, xb_ref, o_ref):
    sig = lax.dot_general(
        xa_ref[0], xb_ref[0],
        dimension_numbers=(((0,), (0,)), ((), ())),
        preferred_element_type=jnp.float32,
    )
    o_ref[0] = sig * inv_nm1


def batched_covariance(xc, n_obs, td=512):
    G, N, D = xc.shape
    assert D % td == 0
    inv = 1.0 / float(n_obs - 1)
    return pl.pallas_call(
        functools.partial(_cov_kernel, inv),
        out_shape=jax.ShapeDtypeStruct((G, D, D), jnp.float32),
        grid_spec=pltpu.PrefetchScalarGridSpec(
            num_scalar_prefetch=0,
            grid=(G, D // td, D // td),
            in_specs=[
                pl.BlockSpec((1, N, td), lambda g, i, j: (g, 0, i)),
                pl.BlockSpec((1, N, td), lambda g, i, j: (g, 0, j)),
            ],
            out_specs=pl.BlockSpec((1, td, td), lambda g, i, j: (g, i, j)),
        ),
        compiler_params=pltpu.CompilerParams(
            dimension_semantics=("parallel", "parallel", "parallel")),
    )(xc, xc)


# --------------------------------------------------------------------------
# Kernel 3: full-K MXU matmul  C = A @ B  (no reduction grid axis / scratch)
# --------------------------------------------------------------------------
def _matmul_kernel(a_ref, b_ref, o_ref):
    o_ref[...] = jnp.dot(
        a_ref[...], b_ref[...], preferred_element_type=jnp.float32
    ).astype(o_ref.dtype)


def matmul_fullk(a, b, tm=256, tn=256):
    M, K = a.shape
    _, N = b.shape
    assert M % tm == 0 and N % tn == 0
    # VMEM: (tm*K + K*tn) * 4B * 2(double-buffer) + out ~= 8.5 MiB -> fits v5e default.
    return pl.pallas_call(
        _matmul_kernel,
        out_shape=jax.ShapeDtypeStruct((M, N), jnp.float32),
        grid_spec=pltpu.PrefetchScalarGridSpec(
            num_scalar_prefetch=0,
            grid=(M // tm, N // tn),
            in_specs=[
                pl.BlockSpec((tm, K), lambda i, j: (i, 0)),
                pl.BlockSpec((K, tn), lambda i, j: (0, j)),
            ],
            out_specs=pl.BlockSpec((tm, tn), lambda i, j: (i, j)),
        ),
        compiler_params=pltpu.CompilerParams(
            dimension_semantics=("parallel", "parallel")),
    )(a, b)


# --------------------------------------------------------------------------
# Kernel 4: covmean = V diag(s) V^T  with the transpose and the diag scaling
#           folded into the kernel (contract on axis 1 of both operands).
# --------------------------------------------------------------------------
def _scaled_vvt_kernel(vr_ref, s_ref, vc_ref, o_ref):
    a = vr_ref[...] * s_ref[...]                              # (tm, D) * (1, D)
    o_ref[...] = lax.dot_general(
        a, vc_ref[...],
        dimension_numbers=(((1,), (1,)), ((), ())),           # A @ B^T pattern
        preferred_element_type=jnp.float32,
    )


def scaled_vvt(v, s, tm=256, tn=256):
    D = v.shape[0]
    assert D % tm == 0 and D % tn == 0
    s2 = s.reshape(1, D).astype(jnp.float32)
    return pl.pallas_call(
        _scaled_vvt_kernel,
        out_shape=jax.ShapeDtypeStruct((D, D), jnp.float32),
        grid_spec=pltpu.PrefetchScalarGridSpec(
            num_scalar_prefetch=0,
            grid=(D // tm, D // tn),
            in_specs=[
                pl.BlockSpec((tm, D), lambda i, j: (i, 0)),
                pl.BlockSpec((1, D), lambda i, j: (0, 0)),
                pl.BlockSpec((tn, D), lambda i, j: (j, 0)),
            ],
            out_specs=pl.BlockSpec((tm, tn), lambda i, j: (i, j)),
        ),
        compiler_params=pltpu.CompilerParams(
            dimension_semantics=("parallel", "parallel")),
    )(v, s2, v)


# --------------------------------------------------------------------------
# Glue: interpolation / pooling matrices, combined encoder weight, FID forward
# --------------------------------------------------------------------------
def bilinear_matrix(in_size, out_size):
    """Row-interpolation matrix matching F.interpolate(mode='bilinear', align_corners=False)."""
    dst = np.arange(out_size, dtype=np.float64)
    src = (dst + 0.5) * (in_size / out_size) - 0.5
    src = np.clip(src, 0.0, in_size - 1)
    i0 = np.floor(src).astype(np.int64)
    i1 = np.minimum(i0 + 1, in_size - 1)
    w1 = (src - i0).astype(np.float32)
    w0 = 1.0 - w1
    Wm = np.zeros((out_size, in_size), dtype=np.float32)
    Wm[np.arange(out_size), i0] += w0
    Wm[np.arange(out_size), i1] += w1
    return Wm


def pool_matrix(in_size, out_size):
    """Adaptive-average-pool style averaging matrix (out_size, in_size)."""
    Wm = np.zeros((out_size, in_size), dtype=np.float32)
    bounds = np.floor(np.arange(out_size + 1) * in_size / out_size).astype(np.int64)
    for p in range(out_size):
        lo, hi = bounds[p], bounds[p + 1]
        Wm[p, lo:hi] = 1.0 / (hi - lo)
    return Wm


def build_encoder_matrix(C, H, W, w_feat):
    """Fold resize(H,W->299,299) -> pool(299->8) -> linear(192->2048) into one (C*H*W, 2048) matrix.

    All three stages are linear, so
        feat = flatten(P @ (Br @ X @ Bc^T) @ P^T) @ Wf  ==  flatten(X) @ M,
    with M precomputed once from the (input-independent) weights.
    """
    # TODO(synk): the pretrained torchvision Inception-v3 conv stack cannot be
    # reproduced without its checkpoint; it is replaced by this deterministic
    # linear surrogate that preserves the (B, 2048) feature shape.
    pr = pool_matrix(INCEPTION_SIZE, POOL)               # (8, 299)
    prw = pr @ bilinear_matrix(H, INCEPTION_SIZE)        # (8, H)  = pool . bilinear rows
    pcw = pr @ bilinear_matrix(W, INCEPTION_SIZE)        # (8, W)  = pool . bilinear cols
    w4 = w_feat.reshape(C, POOL, POOL, FEATURE_DIM)      # flat index order (c, p, q)
    M = jnp.einsum('ph,qw,cpqn->chwn', jnp.asarray(prw), jnp.asarray(pcw), w4)
    return M.reshape(C * H * W, FEATURE_DIM)


def fid_forward(generated_image, real_image, w_feat, b_feat):
    B, C, H, W = generated_image.shape
    enc_w = build_encoder_matrix(C, H, W, w_feat)        # (C*H*W, 2048), input-independent

    # Concatenate gen+real so the encoder runs as a single pallas_call.
    # Note: the reference code only divides the *generated* image by 255;
    # the scale commutes with the linear encoder, applied in-kernel per row.
    x_all = jnp.concatenate([generated_image, real_image], axis=0)
    x_all = x_all.reshape(2 * B, C * H * W).astype(jnp.float32)
    scale = jnp.concatenate(
        [jnp.full((B, 1), 1.0 / 255.0, jnp.float32), jnp.ones((B, 1), jnp.float32)],
        axis=0,
    )

    feats = encoder_linear(x_all, scale, enc_w, b_feat)  # (2B, 2048)
    gen_feat, rl_feat = feats[:B], feats[B:]

    mu_gen = jnp.mean(gen_feat, axis=0)
    mu_rl = jnp.mean(rl_feat, axis=0)

    D = FEATURE_DIM
    if B > 1:
        centered = jnp.stack(
            [gen_feat - mu_gen[None, :], rl_feat - mu_rl[None, :]], axis=0
        )                                               # (2, B, D)
        sig = batched_covariance(centered, B)           # (2, D, D)
        sigma_gen, sigma_rl = sig[0], sig[1]
    else:
        # TODO(synk): intentional guard — torch.cov with a single observation is
        # undefined (NaN); identity keeps the forward finite, matching the ref's
        # own torch.eye fallback for shape[0] <= 1.
        sigma_gen = jnp.eye(D, dtype=jnp.float32)
        sigma_rl = jnp.eye(D, dtype=jnp.float32)

    eps = 1e-6
    eye = jnp.eye(D, dtype=jnp.float32)
    sigma_gen = sigma_gen + eye * eps
    sigma_rl = sigma_rl + eye * eps

    diff = mu_rl - mu_gen
    mu_diff = jnp.sum(diff ** 2)

    # matrix_sqrt (bug-compatible with the reference): X = sigma_gen @ sigma_rl
    # is not symmetric; torch.linalg.eigh reads only the lower triangle, so
    # jnp.linalg.eigh(symmetrize_input=False) matches those semantics.
    X = matmul_fullk(sigma_gen, sigma_rl)
    # TODO(synk): eigh has no Pallas equivalent; jnp.linalg.eigh runs via XLA.
    eigvals, eigvecs = jnp.linalg.eigh(X, symmetrize_input=False)
    s = jnp.sqrt(jnp.maximum(eigvals, 0.0))
    covmean = scaled_vvt(eigvecs, s)                    # V diag(sqrt(l)) V^T

    # trace is linear: trace(A + B - 2C) = tr(A) + tr(B) - 2 tr(C); avoids
    # materializing the 16 MiB sum matrix.
    fid_score = (mu_diff + jnp.trace(sigma_gen) + jnp.trace(sigma_rl)
                 - 2.0 * jnp.trace(covmean))
    return jnp.maximum(fid_score, 0.0)


if __name__ == "__main__":
    key = jax.random.PRNGKey(0)
    k1, k2, k3, k4 = jax.random.split(key, 4)

    B, C, H, W = 2, 3, 16, 16
    generated_image = jax.random.uniform(k1, (B, C, H, W), jnp.float32, 0.0, 255.0)
    real_image = jax.random.uniform(k2, (B, C, H, W), jnp.float32, 0.0, 1.0)

    # Deterministic surrogate-encoder parameters (D=2048 implied by fc=Identity).
    w_feat = jax.random.normal(k3, (C * POOL * POOL, FEATURE_DIM), jnp.float32) * 0.02
    b_feat = jax.random.normal(k4, (FEATURE_DIM,), jnp.float32) * 0.01

    score = fid_forward(generated_image, real_image, w_feat, b_feat)
    jax.block_until_ready(score)
    print("KERNEL_OK")
</pallas_src>

<mosaic_0001>
module attributes {stable_mosaic.version = 11 : i64} {
  func.func @_encoder_kernel(%arg0: i32, %arg1: memref<4x768xf32, #tpu.memory_space<vmem>>, %arg2: memref<4x1xf32, #tpu.memory_space<vmem>>, %arg3: memref<768x1024xf32, #tpu.memory_space<vmem>>, %arg4: memref<1x1024xf32, #tpu.memory_space<vmem>>, %arg5: memref<4x1024xf32, #tpu.memory_space<vmem>>) attributes {dimension_semantics = [#tpu.dimension_semantics<parallel>], iteration_bounds = array<i64: 2>, scalar_prefetch = 0 : i64, scratch_operands = 0 : i64, tpu.core_type = #tpu.core_type<tc>, window_params = [{pipeline_mode = #tpu.pipeline_mode<synchronous>, transform_indices = @transform_0, window_bounds = array<i64: 4, 768>}, {pipeline_mode = #tpu.pipeline_mode<synchronous>, transform_indices = @transform_1, window_bounds = array<i64: 4, 1>}, {transform_indices = @transform_2, window_bounds = array<i64: 768, 1024>}, {transform_indices = @transform_3, window_bounds = array<i64: 1, 1024>}, {transform_indices = @transform_4, window_bounds = array<i64: 4, 1024>}]} {
    %c0 = arith.constant 0 : index
    %c0_0 = arith.constant 0 : index
    %0 = vector.load %arg1[%c0, %c0_0] : memref<4x768xf32, #tpu.memory_space<vmem>>, vector<4x768xf32>
    %c0_1 = arith.constant 0 : index
    %c0_2 = arith.constant 0 : index
    %1 = vector.load %arg2[%c0_1, %c0_2] : memref<4x1xf32, #tpu.memory_space<vmem>>, vector<4x1xf32>
    %2 = vector.broadcast %1 : vector<4x1xf32> to vector<4x768xf32>
    %3 = arith.mulf %0, %2 : vector<4x768xf32>
    %c0_3 = arith.constant 0 : index
    %c0_4 = arith.constant 0 : index
    %4 = vector.load %arg3[%c0_3, %c0_4] : memref<768x1024xf32, #tpu.memory_space<vmem>>, vector<768x1024xf32>
    %cst = arith.constant dense<0.000000e+00> : vector<4x1024xf32>
    %5 = tpu.matmul %3, %4, %cst {dimension_numbers = #tpu.dot_dimension_numbers<[1], [0], [0], [1], [0, 0, 1, 1], [], []>} : vector<4x768xf32>, vector<768x1024xf32>, vector<4x1024xf32> -> vector<4x1024xf32>
    %c0_5 = arith.constant 0 : index
    %c0_6 = arith.constant 0 : index
    %6 = vector.load %arg4[%c0_5, %c0_6] : memref<1x1024xf32, #tpu.memory_space<vmem>>, vector<1x1024xf32>
    %7 = vector.broadcast %6 : vector<1x1024xf32> to vector<4x1024xf32>
    %8 = arith.addf %5, %7 : vector<4x1024xf32>
    %c0_7 = arith.constant 0 : index
    %c0_8 = arith.constant 0 : index
    %9 = vector.load %arg5[%c0_7, %c0_8] : memref<4x1024xf32, #tpu.memory_space<vmem>>, vector<4x1024xf32>
    tpu.vector_store %arg5[%c0_7, %c0_8], %8 {strides = array<i32>} : memref<4x1024xf32, #tpu.memory_space<vmem>>, vector<4x1024xf32>,
    return
  }
  func.func @transform_0(%arg0: i32) -> (i32, i32) {
    %c0_i32 = arith.constant 0 : i32
    %c0_i32_0 = arith.constant 0 : i32
    %c0_i32_1 = arith.constant 0 : i32
    return %c0_i32, %c0_i32_0 : i32, i32
  }
  func.func @transform_1(%arg0: i32) -> (i32, i32) {
    %c0_i32 = arith.constant 0 : i32
    %c0_i32_0 = arith.constant 0 : i32
    %c0_i32_1 = arith.constant 0 : i32
    return %c0_i32, %c0_i32_0 : i32, i32
  }
  func.func @transform_2(%arg0: i32) -> (i32, i32) {
    %c0_i32 = arith.constant 0 : i32
    %c0_i32_0 = arith.constant 0 : i32
    return %c0_i32, %arg0 : i32, i32
  }
  func.func @transform_3(%arg0: i32) -> (i32, i32) {
    %c0_i32 = arith.constant 0 : i32
    %c0_i32_0 = arith.constant 0 : i32
    return %c0_i32, %arg0 : i32, i32
  }
  func.func @transform_4(%arg0: i32) -> (i32, i32) {
    %c0_i32 = arith.constant 0 : i32
    %c0_i32_0 = arith.constant 0 : i32
    return %c0_i32, %arg0 : i32, i32
  }
}

</mosaic_0001>

<bundles_post_ra>
// kernel: tpu_custom_call.1
= control target key start
LH: loop header
LB: loop body
LE: loop exit
PB: predicated region body
PF: predicated region fallthrough
CT: control target
= control target key end

     0   :  { %9 = vsyncpa [#allocation3], 0  ;;  %s3417_s0 = inlined_call_operand.hbm [shape: f32[4,768], index: 0, kind: input, shape index: {}]   ;;  %s3418_s1 = inlined_call_operand.vmem [shape: f32[4,1], index: 1, kind: input, shape index: {}]   ;;  %s3419_s2 = inlined_call_operand.hbm [shape: f32[768,2048], index: 2, kind: input, shape index: {}]   ;;  %s3420_s3 = inlined_call_operand.hbm [shape: f32[1,2048], index: 3, kind: input, shape index: {}]   ;;  %s3421_s4 = inlined_call_operand.hbm [shape: f32[4,2048], index: 4, kind: output, shape index: {}]  }
   0x1   :  { %10 = vsyncpa [#allocation6], 0 }
   0x2   :  { %12 = vsyncpa [#allocation6 + $0x1], 0 }
   0x3   :  { %13 = vsyncpa [#allocation4], 0 }
   0x4   :  { %15 = vsyncpa [#allocation4 + $0x1], 0  ;;  %s2371_s15 = smov 0   ;;  %s2373_s16 = smov 0  }
   0x5   :  { %s2375_s17 = smov 0   ;;  %s2377_s18 = smov 0  }
   0x6 LB: > { %s2392_s19 = sadd.s32 1, %s2335_s18   ;;  %s70_s20 = sadd.s32 1, %s2331_s17  ;;  %s2335_s18 = sphi %s2377_s18, %s3441_s18   ;;  %s2331_s17 = sphi %s2375_s17, %s3440_s17   ;;  %s2327_s16 = sphi %s2373_s16, %s3439_s16   ;;  %s2323_s15 = sphi %s2371_s15, %s3438_s15  }
   0x7   : > { %s67_s21 = ssub.s32 %s2335_s18, %s2392_s19  ;;  %p77_p0 = scmp.ne.s32.totalorder %s2331_s17, %s2327_s16 }
   0x8   : > { %p68_p1 = scmp.eq.s32.totalorder %s67_s21, 0  ;;  %p78_p2 = scmp.eq.s32.totalorder %s2335_s18, 0 }
   0x9   : > { %p2143_p4 = scmp.lt.s32.totalorder %s2335_s18, 2  ;;  %s173_s23 = sand.u32 1, %s2335_s18  }
   0xa   : > { %s2403_s22 = scalar_select %p68_p1, %s2331_s17, %s70_s20  }
   0xb   : > { %p79_p5 = por %p78_p2, %p77_p0  ;;  %s175_s24 = sand.u32 1, %s2331_s17  }
   0xc   : > { %s2115_s25 = smul.u32 6144, %s175_s24  ;;  %s2112_s26 = sshll.u32 %s2335_s18, 10 }
   0xd   : > { %s2416_s29 = scalar_lea.hbm %s3419_s2, %s2112_s26  ;;  %p2418_p6 = pnand %p2143_p4, %p79_p5 }
   0xe   : > { %s177_s5 = scalar_lea.vmem [#allocation5], %s2115_s25  ;;  %s2424_s7 = scalar_lea.sflag [#allocation6], %s173_s23 }
   0xf   : > { %s184_s6 = sshll.u32 %s177_s5, 4  ;;  %s2185_s8 = scalar_lea.hbm %s2416_s29, 98304  ;;  %s2422_s6 = int_to_ptr.vmem [resolvable:$true] %s184_s6 }
  0x10   : > { %p2186_p7 = scmp.ne.s32.totalorder %s2416_s29, %s2185_s8  ;;  %p3422_p8 = pneg %p2418_p6 }
  0x11   : > { %s2190_s11 = scalar_lea.hbm %s3419_s2, 196608  ;;  %p2191_p11 = scmp.lt.s32.totalorder %s2416_s29, %s3419_s2 }
  0x12   : > { %p2188_p9 = pnand %p3422_p8, %p2186_p7  ;;  %p2192_p12 = scmp.lt.s32.totalorder %s2190_s11, %s2185_s8 }
  0x14   : > { %p2189_p10 = pneg %p2188_p9  ;;  %p2193_p13 = por %p2192_p12, %p2191_p11 }
  0x16   : > { %p2194_p1 = pnand %p2193_p13, %p2189_p10 }
  0x18   : > { %2197 = shalt.err (!%p2194_p1)
}
  0x19   : > { %s2198_s14 = scalar_lea.vmem %s2422_s6, 98304  ;;  %s2337_s20 = smov [#allocation5]  }
  0x1a   : > { %p2199_p2 = scmp.ne.s32.totalorder %s2422_s6, %s2198_s14  ;;  %s2203_s21 = sshll.u32 %s2337_s20, 4  ;;  %s2204_s21 = int_to_ptr.vmem [resolvable:$false] %s2203_s21 }
  0x1b   : > { %s2205_s23 = scalar_lea.vmem %s2204_s21, 196608  ;;  %p2206_p7 = scmp.lt.s32.totalorder %s2422_s6, %s2204_s21 }
  0x1c   : > { %p2201_p4 = pnand %p2199_p2, %p3422_p8  ;;  %p2207_p9 = scmp.lt.s32.totalorder %s2205_s23, %s2198_s14 }
  0x1e   : > { %p2202_p5 = pneg %p2201_p4  ;;  %p2208_p3 = por %p2207_p9, %p2206_p7 }
  0x20   : > { %p2209_p11 = pnand %p2208_p3, %p2202_p5 }
  0x22   : > { %2212 = shalt.err (!%p2209_p11)
}
  0x23   : > { %s2338_s25 = smov 2048   ;;  %s2339_s26 = smov 1024  }
  0x24   : > { %s2340_s27 = smov 64   ;;  %s2452_s28 = sadd.s32 4294967295, %s2335_s18  }
  0x25   : > { %2134 = dma.hbm_to_vmem [thread:$0]  (!%p2418_p6), %s2416_s29, 98304, %s2422_s6, %s2424_s7, %s2338_s25, %s2339_s26, %s2340_s27  }
  0x26   : > { %s2094_s5 = sadd.s32 4294967294, %s2335_s18   ;;  %p83_p3 = scmp.ne.s32.totalorder %s2327_s16, %s2323_s15 }
  0x27   : > { %p3424_p10 = scmp.eq.s32.totalorder %s2452_s28, 0  ;;  %p133_p12 = scmp.eq.s32.totalorder %s2452_s28, 1 }
  0x28   : > { %p139_p13 = scmp.eq.s32.totalorder %s2094_s5, 1  ;;  %p2095_p1 = scmp.ge.s32.totalorder %s2335_s18, 1 }
  0x29   : > { %p2462_p2 = por %p3424_p10, %p83_p3  ;;  %p2469_p4 = por %p133_p12, %p77_p0 }
  0x2a   : > { %p2473_p5 = por %p139_p13, %p83_p3  ;;  %p146_p7 = scmp.lt.s32.totalorder %s2335_s18, 3 }
  0x2b   : > { %s3427_s8 = scalar_select %p2462_p2, 1, 0 }
  0x2c   : > { %s3428_s29 = scalar_select %p2469_p4, 1, 0 }
  0x2d   : > { %s3429_s6 = scalar_select %p2473_p5, 1, 0 }
  0x2e   : > { %p2478_p9 = pnand %p2095_p1, %p146_p7  ;;  %s2341_s10 = smov [#allocation2]  }
  0x2f   : > { %s159_s11 = sshll.u32 %s2341_s10, 4  ;;  %s2100_s12 = sshll.u32 %s175_s24, 3  ;;  %s160_s11 = int_to_ptr.vmem [resolvable:$true] %s159_s11 }
  0x30   : > { %p2127_p11 = pneg %p2478_p9  ;;  %s2113_s13 = sshll.u32 %s2335_s18, 7 }
  0x31   : > { %s198_s14 = scalar_lea.vmem [#allocation7], %s2100_s12  ;;  %s2492_s25 = scalar_lea.hbm %s3420_s3, %s2113_s13 }
  0x32   : > { %s206_s20 = sshll.u32 %s198_s14, 4  ;;  %p2128_p0 = pnand %p2127_p11, %p3424_p10  ;;  %s2494_s20 = int_to_ptr.vmem [resolvable:$true] %s206_s20 }
  0x33   : > { %s2224_s26 = scalar_lea.vmem %s160_s11, 384  ;;  %p2232_p7 = scmp.lt.s32.totalorder %s160_s11, %s160_s11 }
  0x34   : > { %p2215_p3 = pneg %p2128_p0  ;;  %p2225_p12 = scmp.ne.s32.totalorder %s160_s11, %s2224_s26 }
  0x35   : > { %p2233_p8 = scmp.lt.s32.totalorder %s2224_s26, %s2224_s26 }
  0x36   : > { %p2227_p13 = pnand %p2225_p12, %p2215_p3 }
  0x37   : > { %p2234_p5 = por %p2233_p8, %p2232_p7 }
  0x38   : > { %p2228_p1 = pneg %p2227_p13 }
  0x3a   : > { %p2235_p4 = pnand %p2234_p5, %p2228_p1 }
  0x3c   : > { %2238 = shalt.err (!%p2235_p4)
}
  0x3d   : > { %2130 = dma.hbm_to_vmem [thread:$0]  (!%p2128_p0), %s3417_s0, 384, %s160_s11, [#allocation3]  }
  0x3e   : > { %s2239_s5 = scalar_lea.hbm %s2492_s25, 128  ;;  %p3431_p10 = pneg %p2418_p6 }
  0x3f   : > { %p2240_p11 = scmp.ne.s32.totalorder %s2492_s25, %s2239_s5  ;;  %s2244_s13 = scalar_lea.hbm %s3420_s3, 256 }
  0x40   : > { %p2245_p8 = scmp.lt.s32.totalorder %s2492_s25, %s3420_s3  ;;  %p2246_p4 = scmp.lt.s32.totalorder %s2244_s13, %s2239_s5 }
  0x41   : > { %p2242_p2 = pnand %p2240_p11, %p3431_p10 }
  0x42   : > { %p2247_p5 = por %p2246_p4, %p2245_p8 }
  0x43   : > { %p2243_p3 = pneg %p2242_p2 }
  0x45   : > { %p2248_p12 = pnand %p2247_p5, %p2243_p3 }
  0x47   : > { %2251 = shalt.err (!%p2248_p12)
}
  0x48   : > { %s2252_s11 = scalar_lea.vmem %s2494_s20, 128  ;;  %s2342_s23 = smov [#allocation7]  }
  0x49   : > { %p2253_p0 = scmp.ne.s32.totalorder %s2494_s20, %s2252_s11  ;;  %s2257_s26 = sshll.u32 %s2342_s23, 4  ;;  %s2258_s26 = int_to_ptr.vmem [resolvable:$false] %s2257_s26 }
  0x4a   : > { %s2259_s24 = scalar_lea.vmem %s2258_s26, 256  ;;  %p2260_p1 = scmp.lt.s32.totalorder %s2494_s20, %s2258_s26 }
  0x4b   : > { %p2255_p2 = pnand %p2253_p0, %p3431_p10  ;;  %p2261_p7 = scmp.lt.s32.totalorder %s2259_s24, %s2252_s11 }
  0x4d   : > { %p2256_p13 = pneg %p2255_p2  ;;  %p2262_p11 = por %p2261_p7, %p2260_p1 }
  0x4f   : > { %p2263_p8 = pnand %p2262_p11, %p2256_p13 }
  0x51   : > { %2266 = shalt.err (!%p2263_p8)
}
  0x52   : > { %2137 = dma.hbm_to_vmem [thread:$0]  (!%p2418_p6), %s2492_s25, 128, %s2494_s20, %s2424_s7  }
  0x53   : > { %215 = sbr.rel (%p2478_p9) target bundleno = 770 (0x302), region = 36  ;;  %p3432_p3 = scmp.eq.s32.totalorder (!%p2478_p9), %s2452_s28, 0 }
  0x58   : > { %2310 = dma.done.wait (%p3432_p3), [#allocation3], 384   ;;  %p3433_p4 = pmov %p3432_p3 }
  0x59   : > { %s221_s27 = sand.u32 1, %s2452_s28   ;;  %s2530_s5 = sand.u32 1, %s2327_s16  }
  0x5a   : > { %2312 = vsyncadd (%p3433_p4), [#allocation3], 4294966912  ;;  %s2116_s30 = smul.u32 6144, %s2530_s5  ;;  %s222_s10 = scalar_lea.sflag [#allocation6], %s221_s27 }
  0x5b   : > { %p3434_p6 = scmp.ne.s32.totalorder %s3427_s8, 0 }
  0x5c   : > { %s2533_s12 = scalar_lea.vmem [#allocation5], %s2116_s30 }
  0x5d   : > { %2314 = dma.done.wait (%p3434_p6), %s222_s10, 98432  }
  0x5e   : > { %2316 = vsyncadd (%p3434_p6), %s222_s10, 4294868864  ;;  %v2343_v0 = vmov 0   ;;  %v270_v1 = vld [vmem:[%s3418_s1] sm:$0xf]  ;;  %v406_v4 = vld [vmem:[%s2533_s12 + $0x3c0] sm:$0xff]  ;;  %s2105_s8 = sshll.u32 %s2530_s5, 3 }
  0x5f   : > { %2184 = vset.pattern.permute.xlu0 %v2343_v0  ;;  %v407_v2 = vld [vmem:[%s2533_s12 + $0x3c8] sm:$0xff]  ;;  %v662_v5 = vld [vmem:[%s2533_s12 + $0xbc0] sm:$0xff]  ;;  %s234_s20 = scalar_lea.vmem [#allocation7], %s2105_s8  ;;  %s2106_s25 = sshll.u32 %s2530_s5, 5 }
  0x60   : > { %v663_v3 = vld [vmem:[%s2533_s12 + $0xbc8] sm:$0xff]  ;;  %273 = vperm.xlu0 %2184, %v270_v1   ;;  %1105 = vmatprep.subr.mxu0 %v407_v2  ;;  %v398_v8 = vld [vmem:[%s2533_s12 + $0x380] sm:$0xff]  ;;  %s3235_s13 = scalar_lea.vmem [#allocation8], %s2106_s25  ;;  %s2114_s14 = sshll.u32 %s2452_s28, 9 }
  0x61   : > { %v399_v6 = vld [vmem:[%s2533_s12 + $0x388] sm:$0xff]  ;;  %1176 = vmatprep.subr.mxu1 %v663_v3  ;;  %1106 = vmatpush1.msra.mxu0 %v406_v4  ;;  %v654_v9 = vld [vmem:[%s2533_s12 + $0xb80] sm:$0xff]  ;;  %s1992_s21 = sshll.u32 %s3235_s13, 4  ;;  %s1990_s26 = scalar_lea.hbm %s3421_s4, %s2114_s14  ;;  %s1993_s21 = int_to_ptr.vmem [resolvable:$true] %s1992_s21 }
  0x62   : > { %v655_v7 = vld [vmem:[%s2533_s12 + $0xb88] sm:$0xff]  ;;  %1177 = vmatpush1.msra.mxu1 %v662_v5  ;;  %1107 = vmatprep.subr.mxu0 %v399_v6  ;;  %v390_v12 = vld [vmem:[%s2533_s12 + $0x340] sm:$0xff]  ;;  %s1978_s24 = scalar_lea.sflag [#allocation4], %s2530_s5  ;;  %s2267_s27 = scalar_lea.vmem %s1993_s21, 512 }
  0x63   : > { %v391_v10 = vld [vmem:[%s2533_s12 + $0x348] sm:$0xff]  ;;  %1178 = vmatprep.subr.mxu1 %v655_v7  ;;  %1108 = vmatpush1.msra.mxu0 %v398_v8  ;;  %v646_v13 = vld [vmem:[%s2533_s12 + $0xb40] sm:$0xff]  ;;  %p2268_p9 = scmp.ne.s32.totalorder %s1993_s21, %s2267_s27  ;;  %p3435_p5 = scmp.ne.s32.totalorder %s3428_s29, 0 }
  0x64   : > { %v647_v11 = vld [vmem:[%s2533_s12 + $0xb48] sm:$0xff]  ;;  %1179 = vmatpush1.msra.mxu1 %v654_v9  ;;  %1109 = vmatprep.subr.mxu0 %v391_v10  ;;  %v382_v16 = vld [vmem:[%s2533_s12 + $0x300] sm:$0xff]  ;;  %s2345_s30 = smov [#allocation8]  }
  0x65   : > { %v383_v14 = vld [vmem:[%s2533_s12 + $0x308] sm:$0xff]  ;;  %1180 = vmatprep.subr.mxu1 %v647_v11  ;;  %1110 = vmatpush1.msra.mxu0 %v390_v12  ;;  %v638_v17 = vld [vmem:[%s2533_s12 + $0xb00] sm:$0xff]  ;;  %p2269_p12 = pnand %p2268_p9, %p3435_p5  ;;  %s2271_s10 = sshll.u32 %s2345_s30, 4  ;;  %s2272_s10 = int_to_ptr.vmem [resolvable:$false] %s2271_s10 }
  0x66   : > { %v639_v15 = vld [vmem:[%s2533_s12 + $0xb08] sm:$0xff]  ;;  %1181 = vmatpush1.msra.mxu1 %v646_v13  ;;  %1111 = vmatprep.subr.mxu0 %v383_v14  ;;  %v374_v20 = vld [vmem:[%s2533_s12 + $0x2c0] sm:$0xff]  ;;  %s2273_s28 = scalar_lea.vmem %s2272_s10, 1024  ;;  %p2274_p10 = scmp.lt.s32.totalorder %s1993_s21, %s2272_s10 }
  0x67   : > { %v375_v18 = vld [vmem:[%s2533_s12 + $0x2c8] sm:$0xff]  ;;  %1182 = vmatprep.subr.mxu1 %v639_v15  ;;  %1112 = vmatpush1.msra.mxu0 %v382_v16  ;;  %v630_v21 = vld [vmem:[%s2533_s12 + $0xac0] sm:$0xff]  ;;  %p2270_p0 = pneg %p2269_p12  ;;  %p2275_p2 = scmp.lt.s32.totalorder %s2273_s28, %s2267_s27 }
  0x68   : > { %v631_v19 = vld [vmem:[%s2533_s12 + $0xac8] sm:$0xff]  ;;  %1183 = vmatpush1.msra.mxu1 %v638_v17  ;;  %1113 = vmatprep.subr.mxu0 %v375_v18  ;;  %v366_v24 = vld [vmem:[%s2533_s12 + $0x280] sm:$0xff] }
  0x69   : > { %v367_v22 = vld [vmem:[%s2533_s12 + $0x288] sm:$0xff]  ;;  %1184 = vmatprep.subr.mxu1 %v631_v19  ;;  %1114 = vmatpush1.msra.mxu0 %v374_v20  ;;  %v622_v25 = vld [vmem:[%s2533_s12 + $0xa80] sm:$0xff]  ;;  %p2276_p13 = por %p2275_p2, %p2274_p10 }
  0x6a   : > { %v623_v23 = vld [vmem:[%s2533_s12 + $0xa88] sm:$0xff]  ;;  %1185 = vmatpush1.msra.mxu1 %v630_v21  ;;  %1115 = vmatprep.subr.mxu0 %v367_v22  ;;  %v358_v28 = vld [vmem:[%s2533_s12 + $0x240] sm:$0xff] }
  0x6b   : > { %v359_v26 = vld [vmem:[%s2533_s12 + $0x248] sm:$0xff]  ;;  %1186 = vmatprep.subr.mxu1 %v623_v23  ;;  %1116 = vmatpush1.msra.mxu0 %v366_v24  ;;  %v614_v29 = vld [vmem:[%s2533_s12 + $0xa40] sm:$0xff]  ;;  %p2277_p1 = pnand %p2276_p13, %p2270_p0 }
  0x6c   : > { %v615_v27 = vld [vmem:[%s2533_s12 + $0xa48] sm:$0xff]  ;;  %1187 = vmatpush1.msra.mxu1 %v622_v25  ;;  %1117 = vmatprep.subr.mxu0 %v359_v26  ;;  %v350_v32 = vld [vmem:[%s2533_s12 + $0x200] sm:$0xff] }
  0x6d   : > { %v351_v30 = vld [vmem:[%s2533_s12 + $0x208] sm:$0xff]  ;;  %1188 = vmatprep.subr.mxu1 %v615_v27  ;;  %1118 = vmatpush1.msra.mxu0 %v358_v28  ;;  %v606_v33 = vld [vmem:[%s2533_s12 + $0xa00] sm:$0xff] }
  0x6e   : > { %v607_v31 = vld [vmem:[%s2533_s12 + $0xa08] sm:$0xff]  ;;  %1189 = vmatpush1.msra.mxu1 %v614_v29  ;;  %1119 = vmatprep.subr.mxu0 %v351_v30  ;;  %v342_v36 = vld [vmem:[%s2533_s12 + $0x1c0] sm:$0xff] }
  0x6f   : > { %v343_v34 = vld [vmem:[%s2533_s12 + $0x1c8] sm:$0xff]  ;;  %1190 = vmatprep.subr.mxu1 %v607_v31  ;;  %1120 = vmatpush1.msra.mxu0 %v350_v32  ;;  %v598_v37 = vld [vmem:[%s2533_s12 + $0x9c0] sm:$0xff] }
  0x70   : > { %v599_v35 = vld [vmem:[%s2533_s12 + $0x9c8] sm:$0xff]  ;;  %1191 = vmatpush1.msra.mxu1 %v606_v33  ;;  %1121 = vmatprep.subr.mxu0 %v343_v34  ;;  %v334_v40 = vld [vmem:[%s2533_s12 + $0x180] sm:$0xff] }
  0x71   : > { %v335_v38 = vld [vmem:[%s2533_s12 + $0x188] sm:$0xff]  ;;  %1192 = vmatprep.subr.mxu1 %v599_v35  ;;  %1122 = vmatpush1.msra.mxu0 %v342_v36  ;;  %v590_v41 = vld [vmem:[%s2533_s12 + $0x980] sm:$0xff] }
  0x72   : > { %v591_v39 = vld [vmem:[%s2533_s12 + $0x988] sm:$0xff]  ;;  %1193 = vmatpush1.msra.mxu1 %v598_v37  ;;  %1123 = vmatprep.subr.mxu0 %v335_v38  ;;  %v326_v44 = vld [vmem:[%s2533_s12 + $0x140] sm:$0xff] }
  0x73   : > { %v327_v42 = vld [vmem:[%s2533_s12 + $0x148] sm:$0xff]  ;;  %1194 = vmatprep.subr.mxu1 %v591_v39  ;;  %1124 = vmatpush1.msra.mxu0 %v334_v40  ;;  %v582_v45 = vld [vmem:[%s2533_s12 + $0x940] sm:$0xff] }
  0x74   : > { %v583_v43 = vld [vmem:[%s2533_s12 + $0x948] sm:$0xff]  ;;  %1195 = vmatpush1.msra.mxu1 %v590_v41  ;;  %1125 = vmatprep.subr.mxu0 %v327_v42  ;;  %v318_v48 = vld [vmem:[%s2533_s12 + $0x100] sm:$0xff] }
  0x75   : > { %v319_v46 = vld [vmem:[%s2533_s12 + $0x108] sm:$0xff]  ;;  %1196 = vmatprep.subr.mxu1 %v583_v43  ;;  %1126 = vmatpush1.msra.mxu0 %v326_v44  ;;  %v574_v49 = vld [vmem:[%s2533_s12 + $0x900] sm:$0xff] }
  0x76   : > { %v575_v47 = vld [vmem:[%s2533_s12 + $0x908] sm:$0xff]  ;;  %1197 = vmatpush1.msra.mxu1 %v582_v45  ;;  %1127 = vmatprep.subr.mxu0 %v319_v46  ;;  %v310_v52 = vld [vmem:[%s2533_s12 + $0xc0] sm:$0xff] }
  0x77   : > { %v311_v50 = vld [vmem:[%s2533_s12 + $0xc8] sm:$0xff]  ;;  %1198 = vmatprep.subr.mxu1 %v575_v47  ;;  %1128 = vmatpush1.msra.mxu0 %v318_v48  ;;  %v566_v53 = vld [vmem:[%s2533_s12 + $0x8c0] sm:$0xff] }
  0x78   : > { %v567_v51 = vld [vmem:[%s2533_s12 + $0x8c8] sm:$0xff]  ;;  %1199 = vmatpush1.msra.mxu1 %v574_v49  ;;  %1129 = vmatprep.subr.mxu0 %v311_v50  ;;  %v302_v56 = vld [vmem:[%s2533_s12 + $0x80] sm:$0xff] }
  0x79   : > { %v303_v54 = vld [vmem:[%s2533_s12 + $0x88] sm:$0xff]  ;;  %1200 = vmatprep.subr.mxu1 %v567_v51  ;;  %1130 = vmatpush1.msra.mxu0 %v310_v52  ;;  %v558_v57 = vld [vmem:[%s2533_s12 + $0x880] sm:$0xff] }
  0x7a   : > { %v559_v55 = vld [vmem:[%s2533_s12 + $0x888] sm:$0xff]  ;;  %1201 = vmatpush1.msra.mxu1 %v566_v53  ;;  %1131 = vmatprep.subr.mxu0 %v303_v54  ;;  %v294_v60 = vld [vmem:[%s2533_s12 + $0x40] sm:$0xff] }
  0x7b   : > { %v295_v58 = vld [vmem:[%s2533_s12 + $0x48] sm:$0xff]  ;;  %1202 = vmatprep.subr.mxu1 %v559_v55  ;;  %1132 = vmatpush1.msra.mxu0 %v302_v56  ;;  %v550_v61 = vld [vmem:[%s2533_s12 + $0x840] sm:$0xff] }
  0x7c   : > { %v551_v59 = vld [vmem:[%s2533_s12 + $0x848] sm:$0xff]  ;;  %1203 = vmatpush1.msra.mxu1 %v558_v57  ;;  %1133 = vmatprep.subr.mxu0 %v295_v58  ;;  %v286_v0 = vld [vmem:[%s2533_s12] sm:$0xff] }
  0x7d   : > { %v287_v62 = vld [vmem:[%s2533_s12 + $0x8] sm:$0xff]  ;;  %1204 = vmatprep.subr.mxu1 %v551_v59  ;;  %1134 = vmatpush1.msra.mxu0 %v294_v60  ;;  %v542_v1 = vld [vmem:[%s2533_s12 + $0x800] sm:$0xff] }
  0x7e   : > { %v543_v63 = vld [vmem:[%s2533_s12 + $0x808] sm:$0xff]  ;;  %1205 = vmatpush1.msra.mxu1 %v550_v61  ;;  %1135 = vmatprep.subr.mxu0 %v287_v62  ;;  %v534_v4 = vld [vmem:[%s2533_s12 + $0x7c0] sm:$0xff] }
  0x7f   : > { %v535_v2 = vld [vmem:[%s2533_s12 + $0x7c8] sm:$0xff]  ;;  %1206 = vmatprep.subr.mxu1 %v543_v63  ;;  %1136 = vmatpush1.msra.mxu0 %v286_v0  ;;  %v790_v5 = vld [vmem:[%s2533_s12 + $0xfc0] sm:$0xff] }
  0x80   : > { %v791_v3 = vld [vmem:[%s2533_s12 + $0xfc8] sm:$0xff]  ;;  %1207 = vmatpush1.msra.mxu1 %v542_v1  ;;  %1137 = vmatprep.subr.mxu0 %v535_v2  ;;  %v526_v8 = vld [vmem:[%s2533_s12 + $0x780] sm:$0xff] }
  0x81   : > { %v527_v6 = vld [vmem:[%s2533_s12 + $0x788] sm:$0xff]  ;;  %1208 = vmatprep.subr.mxu1 %v791_v3  ;;  %1138 = vmatpush2.msra.mxu0 %v534_v4  ;;  %v782_v9 = vld [vmem:[%s2533_s12 + $0xf80] sm:$0xff]  ;;  %v409_v3 = vld [vmem:[%s2533_s12 + $0x3d8] sm:$0xff]  ;;  %v2344_v4 = vmov 839922192  }
  0x82   : > { %v783_v7 = vld [vmem:[%s2533_s12 + $0xf88] sm:$0xff]  ;;  %1209 = vmatpush2.msra.mxu1 %v790_v5  ;;  %1139 = vmatprep.subr.mxu0 %v527_v6  ;;  %v518_v12 = vld [vmem:[%s2533_s12 + $0x740] sm:$0xff]  ;;  %v276_v5 = vunpack.c.l.s4 %v2344_v4  ;;  %v278_v6 = vlaneseq  ;;  %v313_v4 = vld [vmem:[%s2533_s12 + $0xd8] sm:$0xff] }
  0x83   : > { %v519_v10 = vld [vmem:[%s2533_s12 + $0x748] sm:$0xff]  ;;  %1210 = vmatprep.subr.mxu1 %v783_v7  ;;  %1140 = vmatpush2.msra.mxu0 %v526_v8  ;;  %v774_v13 = vld [vmem:[%s2533_s12 + $0xf40] sm:$0xff] }
  0x84   : > { %v775_v11 = vld [vmem:[%s2533_s12 + $0xf48] sm:$0xff]  ;;  %1211 = vmatpush2.msra.mxu1 %v782_v9  ;;  %1141 = vmatprep.subr.mxu0 %v519_v10  ;;  %v510_v16 = vld [vmem:[%s2533_s12 + $0x700] sm:$0xff]  ;;  %v277_v7 = vunpack.c.0.s8 %v276_v5  ;;  %v2672_v8 = vshrl.u32 %v278_v6, 7  ;;  %v312_v6 = vld [vmem:[%s2533_s12 + $0xd0] sm:$0xff] }
  0x85   : > { %v511_v14 = vld [vmem:[%s2533_s12 + $0x708] sm:$0xff]  ;;  %1212 = vmatprep.subr.mxu1 %v775_v11  ;;  %1142 = vmatpush2.msra.mxu0 %v518_v12  ;;  %v766_v17 = vld [vmem:[%s2533_s12 + $0xf00] sm:$0xff]  ;;  %v268_v12 = vld [vmem:[#allocation2 + $0x8] sm:$0xff] }
  0x86   : > { %v767_v15 = vld [vmem:[%s2533_s12 + $0xf08] sm:$0xff]  ;;  %1213 = vmatpush2.msra.mxu1 %v774_v13  ;;  %1143 = vmatprep.subr.mxu0 %v511_v14  ;;  %v502_v20 = vld [vmem:[%s2533_s12 + $0x6c0] sm:$0xff]  ;;  %v280_v9 = vsub.s32 %v277_v7, %v2672_v8  ;;  %v269_v13 = vld [vmem:[#allocation2 + $0x10] sm:$0xff] }
  0x87   : > { %v503_v18 = vld [vmem:[%s2533_s12 + $0x6c8] sm:$0xff]  ;;  %1214 = vmatprep.subr.mxu1 %v767_v15  ;;  %1144 = vmatpush2.msra.mxu0 %v510_v16  ;;  %v758_v21 = vld [vmem:[%s2533_s12 + $0xec0] sm:$0xff] }
  0x88   : > { %v759_v19 = vld [vmem:[%s2533_s12 + $0xec8] sm:$0xff]  ;;  %1215 = vmatpush2.msra.mxu1 %v766_v17  ;;  %1145 = vmatprep.subr.mxu0 %v503_v18  ;;  %v494_v24 = vld [vmem:[%s2533_s12 + $0x680] sm:$0xff] }
  0x89   : > { %v495_v22 = vld [vmem:[%s2533_s12 + $0x688] sm:$0xff]  ;;  %1216 = vmatprep.subr.mxu1 %v759_v19  ;;  %1146 = vmatpush2.msra.mxu0 %v502_v20  ;;  %v750_v25 = vld [vmem:[%s2533_s12 + $0xe80] sm:$0xff] }
  0x8a   : > { %v751_v23 = vld [vmem:[%s2533_s12 + $0xe88] sm:$0xff]  ;;  %1217 = vmatpush2.msra.mxu1 %v758_v21  ;;  %1147 = vmatprep.subr.mxu0 %v495_v22  ;;  %v486_v28 = vld [vmem:[%s2533_s12 + $0x640] sm:$0xff]  ;;  %v408_v21 = vld [vmem:[%s2533_s12 + $0x3d0] sm:$0xff] }
  0x8b   : > { %v487_v26 = vld [vmem:[%s2533_s12 + $0x648] sm:$0xff]  ;;  %1218 = vmatprep.subr.mxu1 %v751_v23  ;;  %1148 = vmatpush2.msra.mxu0 %v494_v24  ;;  %v742_v29 = vld [vmem:[%s2533_s12 + $0xe40] sm:$0xff]  ;;  %v401_v24 = vld [vmem:[%s2533_s12 + $0x398] sm:$0xff] }
  0x8c   : > { %v743_v27 = vld [vmem:[%s2533_s12 + $0xe48] sm:$0xff]  ;;  %1219 = vmatpush2.msra.mxu1 %v750_v25  ;;  %1149 = vmatprep.subr.mxu0 %v487_v26  ;;  %v478_v32 = vld [vmem:[%s2533_s12 + $0x600] sm:$0xff]  ;;  %v400_v26 = vld [vmem:[%s2533_s12 + $0x390] sm:$0xff] }
  0x8d   : > { %v479_v30 = vld [vmem:[%s2533_s12 + $0x608] sm:$0xff]  ;;  %1220 = vmatprep.subr.mxu1 %v743_v27  ;;  %1150 = vmatpush2.msra.mxu0 %v486_v28  ;;  %v734_v33 = vld [vmem:[%s2533_s12 + $0xe00] sm:$0xff]  ;;  %v393_v28 = vld [vmem:[%s2533_s12 + $0x358] sm:$0xff] }
  0x8e   : > { %v735_v31 = vld [vmem:[%s2533_s12 + $0xe08] sm:$0xff]  ;;  %1221 = vmatpush2.msra.mxu1 %v742_v29  ;;  %1151 = vmatprep.subr.mxu0 %v479_v30  ;;  %v470_v36 = vld [vmem:[%s2533_s12 + $0x5c0] sm:$0xff]  ;;  %v392_v30 = vld [vmem:[%s2533_s12 + $0x350] sm:$0xff] }
  0x8f   : > { %v471_v34 = vld [vmem:[%s2533_s12 + $0x5c8] sm:$0xff]  ;;  %1222 = vmatprep.subr.mxu1 %v735_v31  ;;  %1152 = vmatpush2.msra.mxu0 %v478_v32  ;;  %v726_v37 = vld [vmem:[%s2533_s12 + $0xdc0] sm:$0xff]  ;;  %v385_v32 = vld [vmem:[%s2533_s12 + $0x318] sm:$0xff] }
  0x90   : > { %v727_v35 = vld [vmem:[%s2533_s12 + $0xdc8] sm:$0xff]  ;;  %1223 = vmatpush2.msra.mxu1 %v734_v33  ;;  %1153 = vmatprep.subr.mxu0 %v471_v34  ;;  %v462_v40 = vld [vmem:[%s2533_s12 + $0x580] sm:$0xff]  ;;  %v384_v34 = vld [vmem:[%s2533_s12 + $0x310] sm:$0xff] }
  0x91   : > { %v463_v38 = vld [vmem:[%s2533_s12 + $0x588] sm:$0xff]  ;;  %1224 = vmatprep.subr.mxu1 %v727_v35  ;;  %1154 = vmatpush2.msra.mxu0 %v470_v36  ;;  %v718_v41 = vld [vmem:[%s2533_s12 + $0xd80] sm:$0xff]  ;;  %v377_v36 = vld [vmem:[%s2533_s12 + $0x2d8] sm:$0xff] }
  0x92   : > { %v719_v39 = vld [vmem:[%s2533_s12 + $0xd88] sm:$0xff]  ;;  %1225 = vmatpush2.msra.mxu1 %v726_v37  ;;  %1155 = vmatprep.subr.mxu0 %v463_v38  ;;  %v454_v44 = vld [vmem:[%s2533_s12 + $0x540] sm:$0xff]  ;;  %v376_v38 = vld [vmem:[%s2533_s12 + $0x2d0] sm:$0xff] }
  0x93   : > { %v455_v42 = vld [vmem:[%s2533_s12 + $0x548] sm:$0xff]  ;;  %1226 = vmatprep.subr.mxu1 %v719_v39  ;;  %1156 = vmatpush2.msra.mxu0 %v462_v40  ;;  %v710_v45 = vld [vmem:[%s2533_s12 + $0xd40] sm:$0xff]  ;;  %v369_v40 = vld [vmem:[%s2533_s12 + $0x298] sm:$0xff] }
  0x94   : > { %v711_v43 = vld [vmem:[%s2533_s12 + $0xd48] sm:$0xff]  ;;  %1227 = vmatpush2.msra.mxu1 %v718_v41  ;;  %1157 = vmatprep.subr.mxu0 %v455_v42  ;;  %v446_v48 = vld [vmem:[%s2533_s12 + $0x500] sm:$0xff]  ;;  %v368_v42 = vld [vmem:[%s2533_s12 + $0x290] sm:$0xff] }
  0x95   : > { %v447_v46 = vld [vmem:[%s2533_s12 + $0x508] sm:$0xff]  ;;  %1228 = vmatprep.subr.mxu1 %v711_v43  ;;  %1158 = vmatpush2.msra.mxu0 %v454_v44  ;;  %v702_v49 = vld [vmem:[%s2533_s12 + $0xd00] sm:$0xff]  ;;  %v361_v44 = vld [vmem:[%s2533_s12 + $0x258] sm:$0xff] }
  0x96   : > { %v703_v47 = vld [vmem:[%s2533_s12 + $0xd08] sm:$0xff]  ;;  %1229 = vmatpush2.msra.mxu1 %v710_v45  ;;  %1159 = vmatprep.subr.mxu0 %v447_v46  ;;  %v438_v52 = vld [vmem:[%s2533_s12 + $0x4c0] sm:$0xff]  ;;  %v360_v46 = vld [vmem:[%s2533_s12 + $0x250] sm:$0xff] }
  0x97   : > { %v439_v50 = vld [vmem:[%s2533_s12 + $0x4c8] sm:$0xff]  ;;  %1230 = vmatprep.subr.mxu1 %v703_v47  ;;  %1160 = vmatpush2.msra.mxu0 %v446_v48  ;;  %v694_v53 = vld [vmem:[%s2533_s12 + $0xcc0] sm:$0xff]  ;;  %v353_v48 = vld [vmem:[%s2533_s12 + $0x218] sm:$0xff] }
  0x98   : > { %v695_v51 = vld [vmem:[%s2533_s12 + $0xcc8] sm:$0xff]  ;;  %1231 = vmatpush2.msra.mxu1 %v702_v49  ;;  %1161 = vmatprep.subr.mxu0 %v439_v50  ;;  %v430_v56 = vld [vmem:[%s2533_s12 + $0x480] sm:$0xff]  ;;  %v352_v50 = vld [vmem:[%s2533_s12 + $0x210] sm:$0xff] }
  0x99   : > { %v431_v54 = vld [vmem:[%s2533_s12 + $0x488] sm:$0xff]  ;;  %1232 = vmatprep.subr.mxu1 %v695_v51  ;;  %1162 = vmatpush2.msra.mxu0 %v438_v52  ;;  %v686_v57 = vld [vmem:[%s2533_s12 + $0xc80] sm:$0xff]  ;;  %v345_v52 = vld [vmem:[%s2533_s12 + $0x1d8] sm:$0xff] }
  0x9a   : > { %v687_v55 = vld [vmem:[%s2533_s12 + $0xc88] sm:$0xff]  ;;  %1233 = vmatpush2.msra.mxu1 %v694_v53  ;;  %1163 = vmatprep.subr.mxu0 %v431_v54  ;;  %v422_v60 = vld [vmem:[%s2533_s12 + $0x440] sm:$0xff]  ;;  %v344_v54 = vld [vmem:[%s2533_s12 + $0x1d0] sm:$0xff] }
  0x9b   : > { %v423_v58 = vld [vmem:[%s2533_s12 + $0x448] sm:$0xff]  ;;  %1234 = vmatprep.subr.mxu1 %v687_v55  ;;  %1164 = vmatpush2.msra.mxu0 %v430_v56  ;;  %v678_v61 = vld [vmem:[%s2533_s12 + $0xc40] sm:$0xff]  ;;  %v337_v56 = vld [vmem:[%s2533_s12 + $0x198] sm:$0xff] }
  0x9c   : > { %v679_v59 = vld [vmem:[%s2533_s12 + $0xc48] sm:$0xff]  ;;  %1235 = vmatpush2.msra.mxu1 %v686_v57  ;;  %1165 = vmatprep.subr.mxu0 %v423_v58  ;;  %v414_v0 = vld [vmem:[%s2533_s12 + $0x400] sm:$0xff]  ;;  %v336_v58 = vld [vmem:[%s2533_s12 + $0x190] sm:$0xff] }
  0x9d   : > { %v415_v62 = vld [vmem:[%s2533_s12 + $0x408] sm:$0xff]  ;;  %1236 = vmatprep.subr.mxu1 %v679_v59  ;;  %1166 = vmatpush2.msra.mxu0 %v422_v60  ;;  %v670_v1 = vld [vmem:[%s2533_s12 + $0xc00] sm:$0xff]  ;;  %v329_v60 = vld [vmem:[%s2533_s12 + $0x158] sm:$0xff] }
  0x9e   : > { %v671_v63 = vld [vmem:[%s2533_s12 + $0xc08] sm:$0xff]  ;;  %1237 = vmatpush2.msra.mxu1 %v678_v61  ;;  %1167 = vmatprep.subr.mxu0 %v415_v62  ;;  %v918_v20 = vld [vmem:[%s2533_s12 + $0x13c0] sm:$0xff]  ;;  %v328_v62 = vld [vmem:[%s2533_s12 + $0x150] sm:$0xff] }
  0x9f   : > { %v919_v2 = vld [vmem:[%s2533_s12 + $0x13c8] sm:$0xff]  ;;  %1238 = vmatprep.subr.mxu1 %v671_v63  ;;  %1168 = vmatpush2.msra.mxu0 %v414_v0  ;;  %v910_v25 = vld [vmem:[%s2533_s12 + $0x1380] sm:$0xff]  ;;  %v321_v0 = vld [vmem:[%s2533_s12 + $0x118] sm:$0xff] }
  0xa0   : > { %1239 = vmatpush2.msra.mxu1 %v670_v1  ;;  %1247 = vmatprep.subr.mxu0 %v919_v2  ;;  %v267_v11 = vld [vmem:[#allocation2] sm:$0xff]  ;;  %v902_v29 = vld [vmem:[%s2533_s12 + $0x1340] sm:$0xff]  ;;  %v320_v2 = vld [vmem:[%s2533_s12 + $0x110] sm:$0xff] }
  0xa1   : > { %1318 = vmatprep.subr.mxu1 %v409_v3  ;;  %v911_v22 = vld [vmem:[%s2533_s12 + $0x1388] sm:$0xff]  ;;  %v894_v33 = vld [vmem:[%s2533_s12 + $0x1300] sm:$0xff] }
  0xa2   : > { %v903_v27 = vld [vmem:[%s2533_s12 + $0x1348] sm:$0xff]  ;;  %v886_v37 = vld [vmem:[%s2533_s12 + $0x12c0] sm:$0xff] }
  0xa3   : > { %v895_v31 = vld [vmem:[%s2533_s12 + $0x1308] sm:$0xff]  ;;  %v878_v41 = vld [vmem:[%s2533_s12 + $0x1280] sm:$0xff] }
  0xa4   : > { %v887_v35 = vld [vmem:[%s2533_s12 + $0x12c8] sm:$0xff]  ;;  %v870_v45 = vld [vmem:[%s2533_s12 + $0x1240] sm:$0xff] }
  0xa5   : > { %v879_v39 = vld [vmem:[%s2533_s12 + $0x1288] sm:$0xff]  ;;  %v862_v49 = vld [vmem:[%s2533_s12 + $0x1200] sm:$0xff] }
  0xa6   : > { %v871_v43 = vld [vmem:[%s2533_s12 + $0x1248] sm:$0xff]  ;;  %v854_v53 = vld [vmem:[%s2533_s12 + $0x11c0] sm:$0xff] }
  0xa7   : > { %v863_v47 = vld [vmem:[%s2533_s12 + $0x1208] sm:$0xff]  ;;  %v846_v57 = vld [vmem:[%s2533_s12 + $0x1180] sm:$0xff] }
  0xa8   : > { %v855_v51 = vld [vmem:[%s2533_s12 + $0x11c8] sm:$0xff]  ;;  %v838_v61 = vld [vmem:[%s2533_s12 + $0x1140] sm:$0xff] }
  0xa9   : > { %v847_v55 = vld [vmem:[%s2533_s12 + $0x1188] sm:$0xff]  ;;  %v830_v1 = vld [vmem:[%s2533_s12 + $0x1100] sm:$0xff] }
  0xaa   : > { %v839_v59 = vld [vmem:[%s2533_s12 + $0x1148] sm:$0xff]  ;;  %v822_v5 = vld [vmem:[%s2533_s12 + $0x10c0] sm:$0xff] }
  0xab   : > { %v831_v63 = vld [vmem:[%s2533_s12 + $0x1108] sm:$0xff] }
  0xac   : > { %v823_v3 = vld [vmem:[%s2533_s12 + $0x10c8] sm:$0xff] }
  0xad   : > { %v815_v7 = vld [vmem:[%s2533_s12 + $0x1088] sm:$0xff] }
  0xdb   : > { %v274_v10 = vpop.permute.xlu0 %273 }
  0xdc   : > { %v281_v14 = vrot.slane %v274_v10, %v280_v9  ;;  %v305_v9 = vld [vmem:[%s2533_s12 + $0x98] sm:$0xff]  ;;  %v814_v10 = vld [vmem:[%s2533_s12 + $0x1080] sm:$0xff] }
  0xde   : > { %v2675_v15 = vmul.f32 %v281_v14, %v267_v11  ;;  %v2677_v16 = vmul.f32 %v281_v14, %v268_v12  ;;  %v2679_v17 = vmul.f32 %v281_v14, %v269_v13  ;;  %v304_v11 = vld [vmem:[%s2533_s12 + $0x90] sm:$0xff]  ;;  %v807_v12 = vld [vmem:[%s2533_s12 + $0x1048] sm:$0xff]  ;;  %v297_v13 = vld [vmem:[%s2533_s12 + $0x58] sm:$0xff] }
  0xdf   : > { %v806_v14 = vld [vmem:[%s2533_s12 + $0x1040] sm:$0xff] }
  0xe0   : > { %v2683_v18 = vcombine.high %v2675_v15, %v2675_v15  ;;  %v2687_v19 = vcombine.high %v2677_v16, %v2677_v16  ;;  %v2698_v23 = vcombine.high %v2679_v17, %v2679_v17 }
  0xe2   : > { %1169 = vmatprep.mubr.f32.mxu0 %v2683_v18  ;;  %1240 = vmatprep.mubr.f32.mxu1 %v2687_v19 }
  0xe3   : > { %1170 = vmatmul.mubr.f32.vlgmr.msra.gmra.mxu0 %v2675_v15  ;;  %1241 = vmatmul.mubr.f32.vlgmr.msra.gmra.mxu1 %v2677_v16 }
  0xe4   : > { %1248 = vmatpush1.msra.mxu0 %v918_v20  ;;  %1319 = vmatpush1.msra.mxu1 %v408_v21  ;;  %v296_v20 = vld [vmem:[%s2533_s12 + $0x50] sm:$0xff]  ;;  %v799_v21 = vld [vmem:[%s2533_s12 + $0x1008] sm:$0xff] }
  0xe5   : > { %1249 = vmatprep.subr.mxu0 %v911_v22  ;;  %1311 = vmatprep.mubr.f32.mxu0 %v2698_v23  ;;  %v289_v22 = vld [vmem:[%s2533_s12 + $0x18] sm:$0xff] }
  0xe6   : > { %1320 = vmatprep.subr.mxu1 %v401_v24  ;;  %1382 = vmatprep.mubr.f32.mxu1 %v2683_v18  ;;  %v798_v24 = vld [vmem:[%s2533_s12 + $0x1000] sm:$0xff] }
  0xe7   : > { %1250 = vmatpush1.msra.mxu0 %v910_v25  ;;  %1321 = vmatpush1.msra.mxu1 %v400_v26  ;;  %v288_v25 = vld [vmem:[%s2533_s12 + $0x10] sm:$0xff]  ;;  %v1047_v26 = vld [vmem:[%s2533_s12 + $0x17c8] sm:$0xff] }
  0xe8   : > { %1251 = vmatprep.subr.mxu0 %v903_v27  ;;  %1322 = vmatprep.subr.mxu1 %v393_v28  ;;  %v537_v27 = vld [vmem:[%s2533_s12 + $0x7d8] sm:$0xff]  ;;  %v1046_v28 = vld [vmem:[%s2533_s12 + $0x17c0] sm:$0xff] }
  0xe9   : > { %1252 = vmatpush1.msra.mxu0 %v902_v29  ;;  %1323 = vmatpush1.msra.mxu1 %v392_v30  ;;  %v536_v29 = vld [vmem:[%s2533_s12 + $0x7d0] sm:$0xff]  ;;  %v1039_v30 = vld [vmem:[%s2533_s12 + $0x1788] sm:$0xff] }
  0xea   : > { %1253 = vmatprep.subr.mxu0 %v895_v31  ;;  %1324 = vmatprep.subr.mxu1 %v385_v32  ;;  %v529_v31 = vld [vmem:[%s2533_s12 + $0x798] sm:$0xff]  ;;  %v1038_v32 = vld [vmem:[%s2533_s12 + $0x1780] sm:$0xff] }
  0xeb   : > { %1254 = vmatpush1.msra.mxu0 %v894_v33  ;;  %1325 = vmatpush1.msra.mxu1 %v384_v34  ;;  %v528_v33 = vld [vmem:[%s2533_s12 + $0x790] sm:$0xff]  ;;  %v1031_v34 = vld [vmem:[%s2533_s12 + $0x1748] sm:$0xff] }
  0xec   : > { %1255 = vmatprep.subr.mxu0 %v887_v35  ;;  %1326 = vmatprep.subr.mxu1 %v377_v36  ;;  %v521_v35 = vld [vmem:[%s2533_s12 + $0x758] sm:$0xff]  ;;  %v1030_v36 = vld [vmem:[%s2533_s12 + $0x1740] sm:$0xff] }
  0xed   : > { %1256 = vmatpush1.msra.mxu0 %v886_v37  ;;  %1327 = vmatpush1.msra.mxu1 %v376_v38  ;;  %v520_v37 = vld [vmem:[%s2533_s12 + $0x750] sm:$0xff]  ;;  %v1023_v38 = vld [vmem:[%s2533_s12 + $0x1708] sm:$0xff] }
  0xee   : > { %1257 = vmatprep.subr.mxu0 %v879_v39  ;;  %1328 = vmatprep.subr.mxu1 %v369_v40  ;;  %v513_v39 = vld [vmem:[%s2533_s12 + $0x718] sm:$0xff]  ;;  %v1022_v40 = vld [vmem:[%s2533_s12 + $0x1700] sm:$0xff] }
  0xef   : > { %1258 = vmatpush1.msra.mxu0 %v878_v41  ;;  %1329 = vmatpush1.msra.mxu1 %v368_v42  ;;  %v512_v41 = vld [vmem:[%s2533_s12 + $0x710] sm:$0xff]  ;;  %v1015_v42 = vld [vmem:[%s2533_s12 + $0x16c8] sm:$0xff] }
  0xf0   : > { %1259 = vmatprep.subr.mxu0 %v871_v43  ;;  %1330 = vmatprep.subr.mxu1 %v361_v44  ;;  %v505_v43 = vld [vmem:[%s2533_s12 + $0x6d8] sm:$0xff]  ;;  %v1014_v44 = vld [vmem:[%s2533_s12 + $0x16c0] sm:$0xff] }
  0xf1   : > { %1260 = vmatpush1.msra.mxu0 %v870_v45  ;;  %1331 = vmatpush1.msra.mxu1 %v360_v46  ;;  %v504_v45 = vld [vmem:[%s2533_s12 + $0x6d0] sm:$0xff]  ;;  %v1007_v46 = vld [vmem:[%s2533_s12 + $0x1688] sm:$0xff] }
  0xf2   : > { %1261 = vmatprep.subr.mxu0 %v863_v47  ;;  %1332 = vmatprep.subr.mxu1 %v353_v48  ;;  %v497_v47 = vld [vmem:[%s2533_s12 + $0x698] sm:$0xff]  ;;  %v1006_v48 = vld [vmem:[%s2533_s12 + $0x1680] sm:$0xff] }
  0xf3   : > { %1262 = vmatpush1.msra.mxu0 %v862_v49  ;;  %1333 = vmatpush1.msra.mxu1 %v352_v50  ;;  %v496_v49 = vld [vmem:[%s2533_s12 + $0x690] sm:$0xff]  ;;  %v999_v50 = vld [vmem:[%s2533_s12 + $0x1648] sm:$0xff] }
  0xf4   : > { %1263 = vmatprep.subr.mxu0 %v855_v51  ;;  %1334 = vmatprep.subr.mxu1 %v345_v52  ;;  %v489_v51 = vld [vmem:[%s2533_s12 + $0x658] sm:$0xff]  ;;  %v998_v52 = vld [vmem:[%s2533_s12 + $0x1640] sm:$0xff] }
  0xf5   : > { %1264 = vmatpush1.msra.mxu0 %v854_v53  ;;  %1335 = vmatpush1.msra.mxu1 %v344_v54  ;;  %v488_v53 = vld [vmem:[%s2533_s12 + $0x650] sm:$0xff]  ;;  %v991_v54 = vld [vmem:[%s2533_s12 + $0x1608] sm:$0xff] }
  0xf6   : > { %1265 = vmatprep.subr.mxu0 %v847_v55  ;;  %1336 = vmatprep.subr.mxu1 %v337_v56  ;;  %v481_v55 = vld [vmem:[%s2533_s12 + $0x618] sm:$0xff]  ;;  %v990_v56 = vld [vmem:[%s2533_s12 + $0x1600] sm:$0xff] }
  0xf7   : > { %1266 = vmatpush1.msra.mxu0 %v846_v57  ;;  %1337 = vmatpush1.msra.mxu1 %v336_v58  ;;  %v480_v57 = vld [vmem:[%s2533_s12 + $0x610] sm:$0xff]  ;;  %v983_v58 = vld [vmem:[%s2533_s12 + $0x15c8] sm:$0xff] }
  0xf8   : > { %1267 = vmatprep.subr.mxu0 %v839_v59  ;;  %1338 = vmatprep.subr.mxu1 %v329_v60  ;;  %v473_v59 = vld [vmem:[%s2533_s12 + $0x5d8] sm:$0xff]  ;;  %v982_v60 = vld [vmem:[%s2533_s12 + $0x15c0] sm:$0xff] }
  0xf9   : > { %1268 = vmatpush1.msra.mxu0 %v838_v61  ;;  %1339 = vmatpush1.msra.mxu1 %v328_v62  ;;  %v472_v61 = vld [vmem:[%s2533_s12 + $0x5d0] sm:$0xff]  ;;  %v975_v62 = vld [vmem:[%s2533_s12 + $0x1588] sm:$0xff] }
  0xfa   : > { %1269 = vmatprep.subr.mxu0 %v831_v63  ;;  %1340 = vmatprep.subr.mxu1 %v321_v0  ;;  %v465_v63 = vld [vmem:[%s2533_s12 + $0x598] sm:$0xff]  ;;  %v974_v0 = vld [vmem:[%s2533_s12 + $0x1580] sm:$0xff] }
  0xfb   : > { %1270 = vmatpush1.msra.mxu0 %v830_v1  ;;  %1341 = vmatpush1.msra.mxu1 %v320_v2  ;;  %v464_v1 = vld [vmem:[%s2533_s12 + $0x590] sm:$0xff]  ;;  %v967_v2 = vld [vmem:[%s2533_s12 + $0x1548] sm:$0xff] }
  0xfc   : > { %1271 = vmatprep.subr.mxu0 %v823_v3  ;;  %1342 = vmatprep.subr.mxu1 %v313_v4  ;;  %v457_v3 = vld [vmem:[%s2533_s12 + $0x558] sm:$0xff]  ;;  %v966_v4 = vld [vmem:[%s2533_s12 + $0x1540] sm:$0xff] }
  0xfd   : > { %1272 = vmatpush1.msra.mxu0 %v822_v5  ;;  %1343 = vmatpush1.msra.mxu1 %v312_v6  ;;  %v456_v5 = vld [vmem:[%s2533_s12 + $0x550] sm:$0xff]  ;;  %v959_v6 = vld [vmem:[%s2533_s12 + $0x1508] sm:$0xff] }
  0xfe   : > { %1273 = vmatprep.subr.mxu0 %v815_v7  ;;  %1344 = vmatprep.subr.mxu1 %v305_v9  ;;  %v449_v7 = vld [vmem:[%s2533_s12 + $0x518] sm:$0xff]  ;;  %v958_v9 = vld [vmem:[%s2533_s12 + $0x1500] sm:$0xff] }
  0xff   : > { %1274 = vmatpush1.msra.mxu0 %v814_v10  ;;  %1345 = vmatpush1.msra.mxu1 %v304_v11  ;;  %v448_v10 = vld [vmem:[%s2533_s12 + $0x510] sm:$0xff]  ;;  %v951_v11 = vld [vmem:[%s2533_s12 + $0x14c8] sm:$0xff] }
 0x100   : > { %1275 = vmatprep.subr.mxu0 %v807_v12  ;;  %1346 = vmatprep.subr.mxu1 %v297_v13  ;;  %v441_v12 = vld [vmem:[%s2533_s12 + $0x4d8] sm:$0xff]  ;;  %v950_v13 = vld [vmem:[%s2533_s12 + $0x14c0] sm:$0xff] }
 0x101   : > { %1276 = vmatpush1.msra.mxu0 %v806_v14  ;;  %1347 = vmatpush1.msra.mxu1 %v296_v20  ;;  %v440_v14 = vld [vmem:[%s2533_s12 + $0x4d0] sm:$0xff]  ;;  %v943_v20 = vld [vmem:[%s2533_s12 + $0x1488] sm:$0xff] }
 0x102   : > { %1277 = vmatprep.subr.mxu0 %v799_v21  ;;  %1348 = vmatprep.subr.mxu1 %v289_v22  ;;  %v433_v21 = vld [vmem:[%s2533_s12 + $0x498] sm:$0xff]  ;;  %v942_v22 = vld [vmem:[%s2533_s12 + $0x1480] sm:$0xff] }
 0x103   : > { %1278 = vmatpush1.msra.mxu0 %v798_v24  ;;  %1349 = vmatpush1.msra.mxu1 %v288_v25  ;;  %v432_v24 = vld [vmem:[%s2533_s12 + $0x490] sm:$0xff]  ;;  %v935_v25 = vld [vmem:[%s2533_s12 + $0x1448] sm:$0xff] }
 0x104   : > { %1279 = vmatprep.subr.mxu0 %v1047_v26  ;;  %1350 = vmatprep.subr.mxu1 %v537_v27  ;;  %v425_v26 = vld [vmem:[%s2533_s12 + $0x458] sm:$0xff]  ;;  %v934_v27 = vld [vmem:[%s2533_s12 + $0x1440] sm:$0xff] }
 0x105   : > { %1280 = vmatpush2.msra.mxu0 %v1046_v28  ;;  %1351 = vmatpush2.msra.mxu1 %v536_v29  ;;  %v424_v28 = vld [vmem:[%s2533_s12 + $0x450] sm:$0xff]  ;;  %v927_v29 = vld [vmem:[%s2533_s12 + $0x1408] sm:$0xff] }
 0x106   : > { %1281 = vmatprep.subr.mxu0 %v1039_v30  ;;  %1352 = vmatprep.subr.mxu1 %v529_v31  ;;  %v417_v30 = vld [vmem:[%s2533_s12 + $0x418] sm:$0xff]  ;;  %v926_v31 = vld [vmem:[%s2533_s12 + $0x1400] sm:$0xff] }
 0x107   : > { %1282 = vmatpush2.msra.mxu0 %v1038_v32  ;;  %1353 = vmatpush2.msra.mxu1 %v528_v33  ;;  %v416_v32 = vld [vmem:[%s2533_s12 + $0x410] sm:$0xff]  ;;  %v665_v33 = vld [vmem:[%s2533_s12 + $0xbd8] sm:$0xff] }
 0x108   : > { %1283 = vmatprep.subr.mxu0 %v1031_v34  ;;  %1354 = vmatprep.subr.mxu1 %v521_v35  ;;  %v921_v34 = vld [vmem:[%s2533_s12 + $0x13d8] sm:$0xff]  ;;  %v664_v35 = vld [vmem:[%s2533_s12 + $0xbd0] sm:$0xff] }
 0x109   : > { %1284 = vmatpush2.msra.mxu0 %v1030_v36  ;;  %1355 = vmatpush2.msra.mxu1 %v520_v37  ;;  %v920_v36 = vld [vmem:[%s2533_s12 + $0x13d0] sm:$0xff]  ;;  %v657_v37 = vld [vmem:[%s2533_s12 + $0xb98] sm:$0xff] }
 0x10a   : > { %1285 = vmatprep.subr.mxu0 %v1023_v38  ;;  %1356 = vmatprep.subr.mxu1 %v513_v39  ;;  %v913_v38 = vld [vmem:[%s2533_s12 + $0x1398] sm:$0xff]  ;;  %v656_v39 = vld [vmem:[%s2533_s12 + $0xb90] sm:$0xff] }
 0x10b   : > { %1286 = vmatpush2.msra.mxu0 %v1022_v40  ;;  %1357 = vmatpush2.msra.mxu1 %v512_v41  ;;  %v912_v40 = vld [vmem:[%s2533_s12 + $0x1390] sm:$0xff]  ;;  %v649_v41 = vld [vmem:[%s2533_s12 + $0xb58] sm:$0xff] }
 0x10c   : > { %1287 = vmatprep.subr.mxu0 %v1015_v42  ;;  %1358 = vmatprep.subr.mxu1 %v505_v43  ;;  %v905_v42 = vld [vmem:[%s2533_s12 + $0x1358] sm:$0xff]  ;;  %v648_v43 = vld [vmem:[%s2533_s12 + $0xb50] sm:$0xff] }
 0x10d   : > { %1288 = vmatpush2.msra.mxu0 %v1014_v44  ;;  %1359 = vmatpush2.msra.mxu1 %v504_v45  ;;  %v904_v44 = vld [vmem:[%s2533_s12 + $0x1350] sm:$0xff]  ;;  %v641_v45 = vld [vmem:[%s2533_s12 + $0xb18] sm:$0xff] }
 0x10e   : > { %1289 = vmatprep.subr.mxu0 %v1007_v46  ;;  %1360 = vmatprep.subr.mxu1 %v497_v47  ;;  %v897_v46 = vld [vmem:[%s2533_s12 + $0x1318] sm:$0xff]  ;;  %v640_v47 = vld [vmem:[%s2533_s12 + $0xb10] sm:$0xff] }
 0x10f   : > { %1290 = vmatpush2.msra.mxu0 %v1006_v48  ;;  %1361 = vmatpush2.msra.mxu1 %v496_v49  ;;  %v896_v48 = vld [vmem:[%s2533_s12 + $0x1310] sm:$0xff]  ;;  %v633_v49 = vld [vmem:[%s2533_s12 + $0xad8] sm:$0xff] }
 0x110   : > { %1291 = vmatprep.subr.mxu0 %v999_v50  ;;  %1362 = vmatprep.subr.mxu1 %v489_v51  ;;  %v889_v50 = vld [vmem:[%s2533_s12 + $0x12d8] sm:$0xff]  ;;  %v632_v51 = vld [vmem:[%s2533_s12 + $0xad0] sm:$0xff] }
 0x111   : > { %1292 = vmatpush2.msra.mxu0 %v998_v52  ;;  %1363 = vmatpush2.msra.mxu1 %v488_v53  ;;  %v888_v52 = vld [vmem:[%s2533_s12 + $0x12d0] sm:$0xff]  ;;  %v625_v53 = vld [vmem:[%s2533_s12 + $0xa98] sm:$0xff] }
 0x112   : > { %1293 = vmatprep.subr.mxu0 %v991_v54  ;;  %1364 = vmatprep.subr.mxu1 %v481_v55  ;;  %v881_v54 = vld [vmem:[%s2533_s12 + $0x1298] sm:$0xff]  ;;  %v624_v55 = vld [vmem:[%s2533_s12 + $0xa90] sm:$0xff] }
 0x113   : > { %1294 = vmatpush2.msra.mxu0 %v990_v56  ;;  %1365 = vmatpush2.msra.mxu1 %v480_v57  ;;  %v880_v56 = vld [vmem:[%s2533_s12 + $0x1290] sm:$0xff]  ;;  %v617_v57 = vld [vmem:[%s2533_s12 + $0xa58] sm:$0xff] }
 0x114   : > { %1295 = vmatprep.subr.mxu0 %v983_v58  ;;  %1366 = vmatprep.subr.mxu1 %v473_v59  ;;  %v873_v58 = vld [vmem:[%s2533_s12 + $0x1258] sm:$0xff]  ;;  %v616_v59 = vld [vmem:[%s2533_s12 + $0xa50] sm:$0xff] }
 0x115   : > { %1296 = vmatpush2.msra.mxu0 %v982_v60  ;;  %1367 = vmatpush2.msra.mxu1 %v472_v61  ;;  %v872_v60 = vld [vmem:[%s2533_s12 + $0x1250] sm:$0xff]  ;;  %v609_v61 = vld [vmem:[%s2533_s12 + $0xa18] sm:$0xff] }
 0x116   : > { %1297 = vmatprep.subr.mxu0 %v975_v62  ;;  %1368 = vmatprep.subr.mxu1 %v465_v63  ;;  %v865_v62 = vld [vmem:[%s2533_s12 + $0x1218] sm:$0xff]  ;;  %v608_v63 = vld [vmem:[%s2533_s12 + $0xa10] sm:$0xff] }
 0x117   : > { %1298 = vmatpush2.msra.mxu0 %v974_v0  ;;  %1369 = vmatpush2.msra.mxu1 %v464_v1  ;;  %v864_v0 = vld [vmem:[%s2533_s12 + $0x1210] sm:$0xff]  ;;  %v601_v1 = vld [vmem:[%s2533_s12 + $0x9d8] sm:$0xff] }
 0x118   : > { %1299 = vmatprep.subr.mxu0 %v967_v2  ;;  %1370 = vmatprep.subr.mxu1 %v457_v3  ;;  %v857_v2 = vld [vmem:[%s2533_s12 + $0x11d8] sm:$0xff]  ;;  %v600_v3 = vld [vmem:[%s2533_s12 + $0x9d0] sm:$0xff] }
 0x119   : > { %1300 = vmatpush2.msra.mxu0 %v966_v4  ;;  %1371 = vmatpush2.msra.mxu1 %v456_v5  ;;  %v856_v4 = vld [vmem:[%s2533_s12 + $0x11d0] sm:$0xff]  ;;  %v593_v5 = vld [vmem:[%s2533_s12 + $0x998] sm:$0xff] }
 0x11a   : > { %1301 = vmatprep.subr.mxu0 %v959_v6  ;;  %1372 = vmatprep.subr.mxu1 %v449_v7  ;;  %v849_v6 = vld [vmem:[%s2533_s12 + $0x1198] sm:$0xff]  ;;  %v592_v7 = vld [vmem:[%s2533_s12 + $0x990] sm:$0xff] }
 0x11b   : > { %1302 = vmatpush2.msra.mxu0 %v958_v9  ;;  %1373 = vmatpush2.msra.mxu1 %v448_v10  ;;  %v848_v9 = vld [vmem:[%s2533_s12 + $0x1190] sm:$0xff]  ;;  %v585_v10 = vld [vmem:[%s2533_s12 + $0x958] sm:$0xff] }
 0x11c   : > { %1303 = vmatprep.subr.mxu0 %v951_v11  ;;  %1374 = vmatprep.subr.mxu1 %v441_v12  ;;  %v841_v11 = vld [vmem:[%s2533_s12 + $0x1158] sm:$0xff]  ;;  %v584_v12 = vld [vmem:[%s2533_s12 + $0x950] sm:$0xff] }
 0x11d   : > { %1304 = vmatpush2.msra.mxu0 %v950_v13  ;;  %1375 = vmatpush2.msra.mxu1 %v440_v14  ;;  %v840_v13 = vld [vmem:[%s2533_s12 + $0x1150] sm:$0xff]  ;;  %v577_v14 = vld [vmem:[%s2533_s12 + $0x918] sm:$0xff] }
 0x11e   : > { %1305 = vmatprep.subr.mxu0 %v943_v20  ;;  %1376 = vmatprep.subr.mxu1 %v433_v21  ;;  %v833_v20 = vld [vmem:[%s2533_s12 + $0x1118] sm:$0xff]  ;;  %v576_v21 = vld [vmem:[%s2533_s12 + $0x910] sm:$0xff] }
 0x11f   : > { %1306 = vmatpush2.msra.mxu0 %v942_v22  ;;  %1377 = vmatpush2.msra.mxu1 %v432_v24  ;;  %v832_v22 = vld [vmem:[%s2533_s12 + $0x1110] sm:$0xff]  ;;  %v569_v24 = vld [vmem:[%s2533_s12 + $0x8d8] sm:$0xff] }
 0x120   : > { %1307 = vmatprep.subr.mxu0 %v935_v25  ;;  %1378 = vmatprep.subr.mxu1 %v425_v26  ;;  %v825_v25 = vld [vmem:[%s2533_s12 + $0x10d8] sm:$0xff]  ;;  %v568_v26 = vld [vmem:[%s2533_s12 + $0x8d0] sm:$0xff] }
 0x121   : > { %1308 = vmatpush2.msra.mxu0 %v934_v27  ;;  %1379 = vmatpush2.msra.mxu1 %v424_v28  ;;  %v824_v27 = vld [vmem:[%s2533_s12 + $0x10d0] sm:$0xff]  ;;  %v561_v28 = vld [vmem:[%s2533_s12 + $0x898] sm:$0xff] }
 0x122   : > { %1309 = vmatprep.subr.mxu0 %v927_v29  ;;  %1380 = vmatprep.subr.mxu1 %v417_v30  ;;  %v817_v29 = vld [vmem:[%s2533_s12 + $0x1098] sm:$0xff]  ;;  %v560_v30 = vld [vmem:[%s2533_s12 + $0x890] sm:$0xff] }
 0x123   : > { %1310 = vmatpush2.msra.mxu0 %v926_v31  ;;  %1381 = vmatpush2.msra.mxu1 %v416_v32  ;;  %v816_v31 = vld [vmem:[%s2533_s12 + $0x1090] sm:$0xff]  ;;  %v553_v32 = vld [vmem:[%s2533_s12 + $0x858] sm:$0xff] }
 0x124   : > { %1312 = vmatmul.mubr.f32.vlgmr.msra.gmra.mxu0 %v2679_v17  ;;  %1383 = vmatmul.mubr.f32.vlgmr.msra.gmra.mxu1 %v2675_v15 }
 0x125   : > { %1389 = vmatprep.subr.mxu0 %v665_v33  ;;  %1460 = vmatprep.subr.mxu1 %v921_v34  ;;  %v809_v33 = vld [vmem:[%s2533_s12 + $0x1058] sm:$0xff]  ;;  %v552_v34 = vld [vmem:[%s2533_s12 + $0x850] sm:$0xff] }
 0x126   : > { %1390 = vmatpush1.msra.mxu0 %v664_v35  ;;  %1453 = vmatprep.mubr.f32.mxu0 %v2687_v19  ;;  %v808_v35 = vld [vmem:[%s2533_s12 + $0x1050] sm:$0xff] }
 0x127   : > { %1461 = vmatpush1.msra.mxu1 %v920_v36  ;;  %1524 = vmatprep.mubr.f32.mxu1 %v2698_v23  ;;  %v545_v36 = vld [vmem:[%s2533_s12 + $0x818] sm:$0xff] }
 0x128   : > { %1391 = vmatprep.subr.mxu0 %v657_v37  ;;  %1462 = vmatprep.subr.mxu1 %v913_v38  ;;  %v801_v37 = vld [vmem:[%s2533_s12 + $0x1018] sm:$0xff]  ;;  %v544_v38 = vld [vmem:[%s2533_s12 + $0x810] sm:$0xff] }
 0x129   : > { %1392 = vmatpush1.msra.mxu0 %v656_v39  ;;  %1463 = vmatpush1.msra.mxu1 %v912_v40  ;;  %v800_v39 = vld [vmem:[%s2533_s12 + $0x1010] sm:$0xff]  ;;  %v793_v40 = vld [vmem:[%s2533_s12 + $0xfd8] sm:$0xff] }
 0x12a   : > { %1393 = vmatprep.subr.mxu0 %v649_v41  ;;  %1464 = vmatprep.subr.mxu1 %v905_v42  ;;  %v1049_v41 = vld [vmem:[%s2533_s12 + $0x17d8] sm:$0xff]  ;;  %v792_v42 = vld [vmem:[%s2533_s12 + $0xfd0] sm:$0xff] }
 0x12b   : > { %1394 = vmatpush1.msra.mxu0 %v648_v43  ;;  %1465 = vmatpush1.msra.mxu1 %v904_v44  ;;  %v1048_v43 = vld [vmem:[%s2533_s12 + $0x17d0] sm:$0xff]  ;;  %v785_v44 = vld [vmem:[%s2533_s12 + $0xf98] sm:$0xff] }
 0x12c   : > { %1395 = vmatprep.subr.mxu0 %v641_v45  ;;  %1466 = vmatprep.subr.mxu1 %v897_v46  ;;  %v1041_v45 = vld [vmem:[%s2533_s12 + $0x1798] sm:$0xff]  ;;  %v784_v46 = vld [vmem:[%s2533_s12 + $0xf90] sm:$0xff] }
 0x12d   : > { %1396 = vmatpush1.msra.mxu0 %v640_v47  ;;  %1467 = vmatpush1.msra.mxu1 %v896_v48  ;;  %v1040_v47 = vld [vmem:[%s2533_s12 + $0x1790] sm:$0xff]  ;;  %v777_v48 = vld [vmem:[%s2533_s12 + $0xf58] sm:$0xff] }
 0x12e   : > { %1397 = vmatprep.subr.mxu0 %v633_v49  ;;  %1468 = vmatprep.subr.mxu1 %v889_v50  ;;  %v1033_v49 = vld [vmem:[%s2533_s12 + $0x1758] sm:$0xff]  ;;  %v776_v50 = vld [vmem:[%s2533_s12 + $0xf50] sm:$0xff] }
 0x12f   : > { %1398 = vmatpush1.msra.mxu0 %v632_v51  ;;  %1469 = vmatpush1.msra.mxu1 %v888_v52  ;;  %v1032_v51 = vld [vmem:[%s2533_s12 + $0x1750] sm:$0xff]  ;;  %v769_v52 = vld [vmem:[%s2533_s12 + $0xf18] sm:$0xff] }
 0x130   : > { %1399 = vmatprep.subr.mxu0 %v625_v53  ;;  %1470 = vmatprep.subr.mxu1 %v881_v54  ;;  %v1025_v53 = vld [vmem:[%s2533_s12 + $0x1718] sm:$0xff]  ;;  %v768_v54 = vld [vmem:[%s2533_s12 + $0xf10] sm:$0xff] }
 0x131   : > { %1400 = vmatpush1.msra.mxu0 %v624_v55  ;;  %1471 = vmatpush1.msra.mxu1 %v880_v56  ;;  %v1024_v55 = vld [vmem:[%s2533_s12 + $0x1710] sm:$0xff]  ;;  %v761_v56 = vld [vmem:[%s2533_s12 + $0xed8] sm:$0xff] }
 0x132   : > { %1401 = vmatprep.subr.mxu0 %v617_v57  ;;  %1472 = vmatprep.subr.mxu1 %v873_v58  ;;  %v1017_v57 = vld [vmem:[%s2533_s12 + $0x16d8] sm:$0xff]  ;;  %v760_v58 = vld [vmem:[%s2533_s12 + $0xed0] sm:$0xff] }
 0x133   : > { %1402 = vmatpush1.msra.mxu0 %v616_v59  ;;  %1473 = vmatpush1.msra.mxu1 %v872_v60  ;;  %v1016_v59 = vld [vmem:[%s2533_s12 + $0x16d0] sm:$0xff]  ;;  %v753_v60 = vld [vmem:[%s2533_s12 + $0xe98] sm:$0xff] }
 0x134   : > { %1403 = vmatprep.subr.mxu0 %v609_v61  ;;  %1474 = vmatprep.subr.mxu1 %v865_v62  ;;  %v1009_v61 = vld [vmem:[%s2533_s12 + $0x1698] sm:$0xff]  ;;  %v752_v62 = vld [vmem:[%s2533_s12 + $0xe90] sm:$0xff] }
 0x135   : > { %1404 = vmatpush1.msra.mxu0 %v608_v63  ;;  %1475 = vmatpush1.msra.mxu1 %v864_v0  ;;  %v1008_v63 = vld [vmem:[%s2533_s12 + $0x1690] sm:$0xff]  ;;  %v745_v0 = vld [vmem:[%s2533_s12 + $0xe58] sm:$0xff] }
 0x136   : > { %1405 = vmatprep.subr.mxu0 %v601_v1  ;;  %1476 = vmatprep.subr.mxu1 %v857_v2  ;;  %v1001_v1 = vld [vmem:[%s2533_s12 + $0x1658] sm:$0xff]  ;;  %v744_v2 = vld [vmem:[%s2533_s12 + $0xe50] sm:$0xff] }
 0x137   : > { %1406 = vmatpush1.msra.mxu0 %v600_v3  ;;  %1477 = vmatpush1.msra.mxu1 %v856_v4  ;;  %v1000_v3 = vld [vmem:[%s2533_s12 + $0x1650] sm:$0xff]  ;;  %v737_v4 = vld [vmem:[%s2533_s12 + $0xe18] sm:$0xff] }
 0x138   : > { %1407 = vmatprep.subr.mxu0 %v593_v5  ;;  %1478 = vmatprep.subr.mxu1 %v849_v6  ;;  %v993_v5 = vld [vmem:[%s2533_s12 + $0x1618] sm:$0xff]  ;;  %v736_v6 = vld [vmem:[%s2533_s12 + $0xe10] sm:$0xff] }
 0x139   : > { %1408 = vmatpush1.msra.mxu0 %v592_v7  ;;  %1479 = vmatpush1.msra.mxu1 %v848_v9  ;;  %v992_v7 = vld [vmem:[%s2533_s12 + $0x1610] sm:$0xff]  ;;  %v729_v9 = vld [vmem:[%s2533_s12 + $0xdd8] sm:$0xff] }
 0x13a   : > { %1409 = vmatprep.subr.mxu0 %v585_v10  ;;  %1480 = vmatprep.subr.mxu1 %v841_v11  ;;  %v985_v10 = vld [vmem:[%s2533_s12 + $0x15d8] sm:$0xff]  ;;  %v728_v11 = vld [vmem:[%s2533_s12 + $0xdd0] sm:$0xff] }
 0x13b   : > { %1410 = vmatpush1.msra.mxu0 %v584_v12  ;;  %1481 = vmatpush1.msra.mxu1 %v840_v13  ;;  %v984_v12 = vld [vmem:[%s2533_s12 + $0x15d0] sm:$0xff]  ;;  %v721_v13 = vld [vmem:[%s2533_s12 + $0xd98] sm:$0xff] }
 0x13c   : > { %1411 = vmatprep.subr.mxu0 %v577_v14  ;;  %1482 = vmatprep.subr.mxu1 %v833_v20  ;;  %v977_v14 = vld [vmem:[%s2533_s12 + $0x1598] sm:$0xff]  ;;  %v720_v20 = vld [vmem:[%s2533_s12 + $0xd90] sm:$0xff] }
 0x13d   : > { %1412 = vmatpush1.msra.mxu0 %v576_v21  ;;  %1483 = vmatpush1.msra.mxu1 %v832_v22  ;;  %v976_v21 = vld [vmem:[%s2533_s12 + $0x1590] sm:$0xff]  ;;  %v713_v22 = vld [vmem:[%s2533_s12 + $0xd58] sm:$0xff] }
 0x13e   : > { %1413 = vmatprep.subr.mxu0 %v569_v24  ;;  %1484 = vmatprep.subr.mxu1 %v825_v25  ;;  %v969_v24 = vld [vmem:[%s2533_s12 + $0x1558] sm:$0xff]  ;;  %v712_v25 = vld [vmem:[%s2533_s12 + $0xd50] sm:$0xff] }
 0x13f   : > { %1414 = vmatpush1.msra.mxu0 %v568_v26  ;;  %1485 = vmatpush1.msra.mxu1 %v824_v27  ;;  %v968_v26 = vld [vmem:[%s2533_s12 + $0x1550] sm:$0xff]  ;;  %v705_v27 = vld [vmem:[%s2533_s12 + $0xd18] sm:$0xff] }
 0x140   : > { %1415 = vmatprep.subr.mxu0 %v561_v28  ;;  %1486 = vmatprep.subr.mxu1 %v817_v29  ;;  %v961_v28 = vld [vmem:[%s2533_s12 + $0x1518] sm:$0xff]  ;;  %v704_v29 = vld [vmem:[%s2533_s12 + $0xd10] sm:$0xff] }
 0x141   : > { %1416 = vmatpush1.msra.mxu0 %v560_v30  ;;  %1487 = vmatpush1.msra.mxu1 %v816_v31  ;;  %v960_v30 = vld [vmem:[%s2533_s12 + $0x1510] sm:$0xff]  ;;  %v697_v31 = vld [vmem:[%s2533_s12 + $0xcd8] sm:$0xff] }
 0x142   : > { %1417 = vmatprep.subr.mxu0 %v553_v32  ;;  %1488 = vmatprep.subr.mxu1 %v809_v33  ;;  %v953_v32 = vld [vmem:[%s2533_s12 + $0x14d8] sm:$0xff]  ;;  %v696_v33 = vld [vmem:[%s2533_s12 + $0xcd0] sm:$0xff] }
 0x143   : > { %1418 = vmatpush1.msra.mxu0 %v552_v34  ;;  %1489 = vmatpush1.msra.mxu1 %v808_v35  ;;  %v952_v34 = vld [vmem:[%s2533_s12 + $0x14d0] sm:$0xff]  ;;  %v689_v35 = vld [vmem:[%s2533_s12 + $0xc98] sm:$0xff] }
 0x144   : > { %1419 = vmatprep.subr.mxu0 %v545_v36  ;;  %1490 = vmatprep.subr.mxu1 %v801_v37  ;;  %v945_v36 = vld [vmem:[%s2533_s12 + $0x1498] sm:$0xff]  ;;  %v688_v37 = vld [vmem:[%s2533_s12 + $0xc90] sm:$0xff] }
 0x145   : > { %1420 = vmatpush1.msra.mxu0 %v544_v38  ;;  %1491 = vmatpush1.msra.mxu1 %v800_v39  ;;  %v944_v38 = vld [vmem:[%s2533_s12 + $0x1490] sm:$0xff]  ;;  %v681_v39 = vld [vmem:[%s2533_s12 + $0xc58] sm:$0xff] }
 0x146   : > { %1421 = vmatprep.subr.mxu0 %v793_v40  ;;  %1492 = vmatprep.subr.mxu1 %v1049_v41  ;;  %v937_v40 = vld [vmem:[%s2533_s12 + $0x1458] sm:$0xff]  ;;  %v680_v41 = vld [vmem:[%s2533_s12 + $0xc50] sm:$0xff] }
 0x147   : > { %1422 = vmatpush2.msra.mxu0 %v792_v42  ;;  %1493 = vmatpush2.msra.mxu1 %v1048_v43  ;;  %v936_v42 = vld [vmem:[%s2533_s12 + $0x1450] sm:$0xff]  ;;  %v673_v43 = vld [vmem:[%s2533_s12 + $0xc18] sm:$0xff] }
 0x148   : > { %1423 = vmatprep.subr.mxu0 %v785_v44  ;;  %1494 = vmatprep.subr.mxu1 %v1041_v45  ;;  %v929_v44 = vld [vmem:[%s2533_s12 + $0x1418] sm:$0xff]  ;;  %v672_v45 = vld [vmem:[%s2533_s12 + $0xc10] sm:$0xff] }
 0x149   : > { %1424 = vmatpush2.msra.mxu0 %v784_v46  ;;  %1495 = vmatpush2.msra.mxu1 %v1040_v47  ;;  %v928_v46 = vld [vmem:[%s2533_s12 + $0x1410] sm:$0xff]  ;;  %v411_v47 = vld [vmem:[%s2533_s12 + $0x3e8] sm:$0xff] }
 0x14a   : > { %1425 = vmatprep.subr.mxu0 %v777_v48  ;;  %1496 = vmatprep.subr.mxu1 %v1033_v49  ;;  %v667_v48 = vld [vmem:[%s2533_s12 + $0xbe8] sm:$0xff]  ;;  %v410_v49 = vld [vmem:[%s2533_s12 + $0x3e0] sm:$0xff] }
 0x14b   : > { %1426 = vmatpush2.msra.mxu0 %v776_v50  ;;  %1497 = vmatpush2.msra.mxu1 %v1032_v51  ;;  %v666_v50 = vld [vmem:[%s2533_s12 + $0xbe0] sm:$0xff]  ;;  %v403_v51 = vld [vmem:[%s2533_s12 + $0x3a8] sm:$0xff] }
 0x14c   : > { %1427 = vmatprep.subr.mxu0 %v769_v52  ;;  %1498 = vmatprep.subr.mxu1 %v1025_v53  ;;  %v659_v52 = vld [vmem:[%s2533_s12 + $0xba8] sm:$0xff]  ;;  %v402_v53 = vld [vmem:[%s2533_s12 + $0x3a0] sm:$0xff] }
 0x14d   : > { %1428 = vmatpush2.msra.mxu0 %v768_v54  ;;  %1499 = vmatpush2.msra.mxu1 %v1024_v55  ;;  %v658_v54 = vld [vmem:[%s2533_s12 + $0xba0] sm:$0xff]  ;;  %v395_v55 = vld [vmem:[%s2533_s12 + $0x368] sm:$0xff] }
 0x14e   : > { %1429 = vmatprep.subr.mxu0 %v761_v56  ;;  %1500 = vmatprep.subr.mxu1 %v1017_v57  ;;  %v651_v56 = vld [vmem:[%s2533_s12 + $0xb68] sm:$0xff]  ;;  %v394_v57 = vld [vmem:[%s2533_s12 + $0x360] sm:$0xff] }
 0x14f   : > { %1430 = vmatpush2.msra.mxu0 %v760_v58  ;;  %1501 = vmatpush2.msra.mxu1 %v1016_v59  ;;  %v650_v58 = vld [vmem:[%s2533_s12 + $0xb60] sm:$0xff]  ;;  %v387_v59 = vld [vmem:[%s2533_s12 + $0x328] sm:$0xff] }
 0x150   : > { %1431 = vmatprep.subr.mxu0 %v753_v60  ;;  %1502 = vmatprep.subr.mxu1 %v1009_v61  ;;  %v643_v60 = vld [vmem:[%s2533_s12 + $0xb28] sm:$0xff]  ;;  %v386_v61 = vld [vmem:[%s2533_s12 + $0x320] sm:$0xff] }
 0x151   : > { %1432 = vmatpush2.msra.mxu0 %v752_v62  ;;  %1503 = vmatpush2.msra.mxu1 %v1008_v63  ;;  %v642_v62 = vld [vmem:[%s2533_s12 + $0xb20] sm:$0xff]  ;;  %v379_v63 = vld [vmem:[%s2533_s12 + $0x2e8] sm:$0xff] }
 0x152   : > { %1433 = vmatprep.subr.mxu0 %v745_v0  ;;  %1504 = vmatprep.subr.mxu1 %v1001_v1  ;;  %v635_v0 = vld [vmem:[%s2533_s12 + $0xae8] sm:$0xff]  ;;  %v378_v1 = vld [vmem:[%s2533_s12 + $0x2e0] sm:$0xff] }
 0x153   : > { %1434 = vmatpush2.msra.mxu0 %v744_v2  ;;  %1505 = vmatpush2.msra.mxu1 %v1000_v3  ;;  %v634_v2 = vld [vmem:[%s2533_s12 + $0xae0] sm:$0xff]  ;;  %v371_v3 = vld [vmem:[%s2533_s12 + $0x2a8] sm:$0xff] }
 0x154   : > { %1435 = vmatprep.subr.mxu0 %v737_v4  ;;  %1506 = vmatprep.subr.mxu1 %v993_v5  ;;  %v627_v4 = vld [vmem:[%s2533_s12 + $0xaa8] sm:$0xff]  ;;  %v370_v5 = vld [vmem:[%s2533_s12 + $0x2a0] sm:$0xff] }
 0x155   : > { %1436 = vmatpush2.msra.mxu0 %v736_v6  ;;  %1507 = vmatpush2.msra.mxu1 %v992_v7  ;;  %v626_v6 = vld [vmem:[%s2533_s12 + $0xaa0] sm:$0xff]  ;;  %v363_v7 = vld [vmem:[%s2533_s12 + $0x268] sm:$0xff] }
 0x156   : > { %1437 = vmatprep.subr.mxu0 %v729_v9  ;;  %1508 = vmatprep.subr.mxu1 %v985_v10  ;;  %v619_v9 = vld [vmem:[%s2533_s12 + $0xa68] sm:$0xff]  ;;  %v362_v10 = vld [vmem:[%s2533_s12 + $0x260] sm:$0xff] }
 0x157   : > { %1438 = vmatpush2.msra.mxu0 %v728_v11  ;;  %1509 = vmatpush2.msra.mxu1 %v984_v12  ;;  %v618_v11 = vld [vmem:[%s2533_s12 + $0xa60] sm:$0xff]  ;;  %v355_v12 = vld [vmem:[%s2533_s12 + $0x228] sm:$0xff] }
 0x158   : > { %1439 = vmatprep.subr.mxu0 %v721_v13  ;;  %1510 = vmatprep.subr.mxu1 %v977_v14  ;;  %v611_v13 = vld [vmem:[%s2533_s12 + $0xa28] sm:$0xff]  ;;  %v354_v14 = vld [vmem:[%s2533_s12 + $0x220] sm:$0xff] }
 0x159   : > { %1440 = vmatpush2.msra.mxu0 %v720_v20  ;;  %1511 = vmatpush2.msra.mxu1 %v976_v21  ;;  %v610_v20 = vld [vmem:[%s2533_s12 + $0xa20] sm:$0xff]  ;;  %v347_v21 = vld [vmem:[%s2533_s12 + $0x1e8] sm:$0xff] }
 0x15a   : > { %1441 = vmatprep.subr.mxu0 %v713_v22  ;;  %1512 = vmatprep.subr.mxu1 %v969_v24  ;;  %v603_v22 = vld [vmem:[%s2533_s12 + $0x9e8] sm:$0xff]  ;;  %v346_v24 = vld [vmem:[%s2533_s12 + $0x1e0] sm:$0xff] }
 0x15b   : > { %1442 = vmatpush2.msra.mxu0 %v712_v25  ;;  %1513 = vmatpush2.msra.mxu1 %v968_v26  ;;  %v602_v25 = vld [vmem:[%s2533_s12 + $0x9e0] sm:$0xff]  ;;  %v339_v26 = vld [vmem:[%s2533_s12 + $0x1a8] sm:$0xff] }
 0x15c   : > { %1443 = vmatprep.subr.mxu0 %v705_v27  ;;  %1514 = vmatprep.subr.mxu1 %v961_v28  ;;  %v595_v27 = vld [vmem:[%s2533_s12 + $0x9a8] sm:$0xff]  ;;  %v338_v28 = vld [vmem:[%s2533_s12 + $0x1a0] sm:$0xff] }
 0x15d   : > { %1444 = vmatpush2.msra.mxu0 %v704_v29  ;;  %1515 = vmatpush2.msra.mxu1 %v960_v30  ;;  %v594_v29 = vld [vmem:[%s2533_s12 + $0x9a0] sm:$0xff]  ;;  %v331_v30 = vld [vmem:[%s2533_s12 + $0x168] sm:$0xff] }
 0x15e   : > { %1445 = vmatprep.subr.mxu0 %v697_v31  ;;  %1516 = vmatprep.subr.mxu1 %v953_v32  ;;  %v587_v31 = vld [vmem:[%s2533_s12 + $0x968] sm:$0xff]  ;;  %v330_v32 = vld [vmem:[%s2533_s12 + $0x160] sm:$0xff] }
 0x15f   : > { %1446 = vmatpush2.msra.mxu0 %v696_v33  ;;  %1517 = vmatpush2.msra.mxu1 %v952_v34  ;;  %v586_v33 = vld [vmem:[%s2533_s12 + $0x960] sm:$0xff]  ;;  %v323_v34 = vld [vmem:[%s2533_s12 + $0x128] sm:$0xff] }
 0x160   : > { %1447 = vmatprep.subr.mxu0 %v689_v35  ;;  %1518 = vmatprep.subr.mxu1 %v945_v36  ;;  %v579_v35 = vld [vmem:[%s2533_s12 + $0x928] sm:$0xff]  ;;  %v322_v36 = vld [vmem:[%s2533_s12 + $0x120] sm:$0xff] }
 0x161   : > { %1448 = vmatpush2.msra.mxu0 %v688_v37  ;;  %1519 = vmatpush2.msra.mxu1 %v944_v38  ;;  %v578_v37 = vld [vmem:[%s2533_s12 + $0x920] sm:$0xff]  ;;  %v315_v38 = vld [vmem:[%s2533_s12 + $0xe8] sm:$0xff] }
 0x162   : > { %1449 = vmatprep.subr.mxu0 %v681_v39  ;;  %1520 = vmatprep.subr.mxu1 %v937_v40  ;;  %v571_v39 = vld [vmem:[%s2533_s12 + $0x8e8] sm:$0xff]  ;;  %v314_v40 = vld [vmem:[%s2533_s12 + $0xe0] sm:$0xff] }
 0x163   : > { %1450 = vmatpush2.msra.mxu0 %v680_v41  ;;  %1521 = vmatpush2.msra.mxu1 %v936_v42  ;;  %v570_v41 = vld [vmem:[%s2533_s12 + $0x8e0] sm:$0xff]  ;;  %v307_v42 = vld [vmem:[%s2533_s12 + $0xa8] sm:$0xff] }
 0x164   : > { %1451 = vmatprep.subr.mxu0 %v673_v43  ;;  %1522 = vmatprep.subr.mxu1 %v929_v44  ;;  %v563_v43 = vld [vmem:[%s2533_s12 + $0x8a8] sm:$0xff]  ;;  %v306_v44 = vld [vmem:[%s2533_s12 + $0xa0] sm:$0xff] }
 0x165   : > { %1452 = vmatpush2.msra.mxu0 %v672_v45  ;;  %1523 = vmatpush2.msra.mxu1 %v928_v46  ;;  %v562_v45 = vld [vmem:[%s2533_s12 + $0x8a0] sm:$0xff]  ;;  %v299_v46 = vld [vmem:[%s2533_s12 + $0x68] sm:$0xff] }
 0x166   : > { %1454 = vmatmul.mubr.f32.vlgmr.msra.gmra.mxu0 %v2677_v16  ;;  %1525 = vmatmul.mubr.f32.vlgmr.msra.gmra.mxu1 %v2679_v17 }
 0x167   : > { %1531 = vmatprep.subr.mxu0 %v411_v47  ;;  %1602 = vmatprep.subr.mxu1 %v667_v48  ;;  %v555_v47 = vld [vmem:[%s2533_s12 + $0x868] sm:$0xff]  ;;  %v298_v48 = vld [vmem:[%s2533_s12 + $0x60] sm:$0xff] }
 0x168   : > { %1532 = vmatpush1.msra.mxu0 %v410_v49  ;;  %1595 = vmatprep.mubr.f32.mxu0 %v2683_v18  ;;  %v554_v49 = vld [vmem:[%s2533_s12 + $0x860] sm:$0xff] }
 0x169   : > { %1603 = vmatpush1.msra.mxu1 %v666_v50  ;;  %1666 = vmatprep.mubr.f32.mxu1 %v2687_v19  ;;  %v291_v50 = vld [vmem:[%s2533_s12 + $0x28] sm:$0xff] }
 0x16a   : > { %1533 = vmatprep.subr.mxu0 %v403_v51  ;;  %1604 = vmatprep.subr.mxu1 %v659_v52  ;;  %v547_v51 = vld [vmem:[%s2533_s12 + $0x828] sm:$0xff]  ;;  %v290_v52 = vld [vmem:[%s2533_s12 + $0x20] sm:$0xff] }
 0x16b   : > { %1534 = vmatpush1.msra.mxu0 %v402_v53  ;;  %1605 = vmatpush1.msra.mxu1 %v658_v54  ;;  %v546_v53 = vld [vmem:[%s2533_s12 + $0x820] sm:$0xff]  ;;  %v539_v54 = vld [vmem:[%s2533_s12 + $0x7e8] sm:$0xff] }
 0x16c   : > { %1535 = vmatprep.subr.mxu0 %v395_v55  ;;  %1606 = vmatprep.subr.mxu1 %v651_v56  ;;  %v795_v55 = vld [vmem:[%s2533_s12 + $0xfe8] sm:$0xff]  ;;  %v538_v56 = vld [vmem:[%s2533_s12 + $0x7e0] sm:$0xff] }
 0x16d   : > { %1536 = vmatpush1.msra.mxu0 %v394_v57  ;;  %1607 = vmatpush1.msra.mxu1 %v650_v58  ;;  %v794_v57 = vld [vmem:[%s2533_s12 + $0xfe0] sm:$0xff]  ;;  %v531_v58 = vld [vmem:[%s2533_s12 + $0x7a8] sm:$0xff] }
 0x16e   : > { %1537 = vmatprep.subr.mxu0 %v387_v59  ;;  %1608 = vmatprep.subr.mxu1 %v643_v60  ;;  %v787_v59 = vld [vmem:[%s2533_s12 + $0xfa8] sm:$0xff]  ;;  %v530_v60 = vld [vmem:[%s2533_s12 + $0x7a0] sm:$0xff] }
 0x16f   : > { %1538 = vmatpush1.msra.mxu0 %v386_v61  ;;  %1609 = vmatpush1.msra.mxu1 %v642_v62  ;;  %v786_v61 = vld [vmem:[%s2533_s12 + $0xfa0] sm:$0xff]  ;;  %v523_v62 = vld [vmem:[%s2533_s12 + $0x768] sm:$0xff] }
 0x170   : > { %1539 = vmatprep.subr.mxu0 %v379_v63  ;;  %1610 = vmatprep.subr.mxu1 %v635_v0  ;;  %v779_v63 = vld [vmem:[%s2533_s12 + $0xf68] sm:$0xff]  ;;  %v522_v0 = vld [vmem:[%s2533_s12 + $0x760] sm:$0xff] }
 0x171   : > { %1540 = vmatpush1.msra.mxu0 %v378_v1  ;;  %1611 = vmatpush1.msra.mxu1 %v634_v2  ;;  %v778_v1 = vld [vmem:[%s2533_s12 + $0xf60] sm:$0xff]  ;;  %v515_v2 = vld [vmem:[%s2533_s12 + $0x728] sm:$0xff] }
 0x172   : > { %1541 = vmatprep.subr.mxu0 %v371_v3  ;;  %1612 = vmatprep.subr.mxu1 %v627_v4  ;;  %v771_v3 = vld [vmem:[%s2533_s12 + $0xf28] sm:$0xff]  ;;  %v514_v4 = vld [vmem:[%s2533_s12 + $0x720] sm:$0xff] }
 0x173   : > { %1542 = vmatpush1.msra.mxu0 %v370_v5  ;;  %1613 = vmatpush1.msra.mxu1 %v626_v6  ;;  %v770_v5 = vld [vmem:[%s2533_s12 + $0xf20] sm:$0xff]  ;;  %v507_v6 = vld [vmem:[%s2533_s12 + $0x6e8] sm:$0xff] }
 0x174   : > { %1543 = vmatprep.subr.mxu0 %v363_v7  ;;  %1614 = vmatprep.subr.mxu1 %v619_v9  ;;  %v763_v7 = vld [vmem:[%s2533_s12 + $0xee8] sm:$0xff]  ;;  %v506_v9 = vld [vmem:[%s2533_s12 + $0x6e0] sm:$0xff] }
 0x175   : > { %1544 = vmatpush1.msra.mxu0 %v362_v10  ;;  %1615 = vmatpush1.msra.mxu1 %v618_v11  ;;  %v762_v10 = vld [vmem:[%s2533_s12 + $0xee0] sm:$0xff]  ;;  %v499_v11 = vld [vmem:[%s2533_s12 + $0x6a8] sm:$0xff] }
 0x176   : > { %1545 = vmatprep.subr.mxu0 %v355_v12  ;;  %1616 = vmatprep.subr.mxu1 %v611_v13  ;;  %v755_v12 = vld [vmem:[%s2533_s12 + $0xea8] sm:$0xff]  ;;  %v498_v13 = vld [vmem:[%s2533_s12 + $0x6a0] sm:$0xff] }
 0x177   : > { %1546 = vmatpush1.msra.mxu0 %v354_v14  ;;  %1617 = vmatpush1.msra.mxu1 %v610_v20  ;;  %v754_v14 = vld [vmem:[%s2533_s12 + $0xea0] sm:$0xff]  ;;  %v491_v20 = vld [vmem:[%s2533_s12 + $0x668] sm:$0xff] }
 0x178   : > { %1547 = vmatprep.subr.mxu0 %v347_v21  ;;  %1618 = vmatprep.subr.mxu1 %v603_v22  ;;  %v747_v21 = vld [vmem:[%s2533_s12 + $0xe68] sm:$0xff]  ;;  %v490_v22 = vld [vmem:[%s2533_s12 + $0x660] sm:$0xff] }
 0x179   : > { %1548 = vmatpush1.msra.mxu0 %v346_v24  ;;  %1619 = vmatpush1.msra.mxu1 %v602_v25  ;;  %v746_v24 = vld [vmem:[%s2533_s12 + $0xe60] sm:$0xff]  ;;  %v483_v25 = vld [vmem:[%s2533_s12 + $0x628] sm:$0xff] }
 0x17a   : > { %1549 = vmatprep.subr.mxu0 %v339_v26  ;;  %1620 = vmatprep.subr.mxu1 %v595_v27  ;;  %v739_v26 = vld [vmem:[%s2533_s12 + $0xe28] sm:$0xff]  ;;  %v482_v27 = vld [vmem:[%s2533_s12 + $0x620] sm:$0xff] }
 0x17b   : > { %1550 = vmatpush1.msra.mxu0 %v338_v28  ;;  %1621 = vmatpush1.msra.mxu1 %v594_v29  ;;  %v738_v28 = vld [vmem:[%s2533_s12 + $0xe20] sm:$0xff]  ;;  %v475_v29 = vld [vmem:[%s2533_s12 + $0x5e8] sm:$0xff] }
 0x17c   : > { %1551 = vmatprep.subr.mxu0 %v331_v30  ;;  %1622 = vmatprep.subr.mxu1 %v587_v31  ;;  %v731_v30 = vld [vmem:[%s2533_s12 + $0xde8] sm:$0xff]  ;;  %v474_v31 = vld [vmem:[%s2533_s12 + $0x5e0] sm:$0xff] }
 0x17d   : > { %1552 = vmatpush1.msra.mxu0 %v330_v32  ;;  %1623 = vmatpush1.msra.mxu1 %v586_v33  ;;  %v730_v32 = vld [vmem:[%s2533_s12 + $0xde0] sm:$0xff]  ;;  %v467_v33 = vld [vmem:[%s2533_s12 + $0x5a8] sm:$0xff] }
 0x17e   : > { %1553 = vmatprep.subr.mxu0 %v323_v34  ;;  %1624 = vmatprep.subr.mxu1 %v579_v35  ;;  %v723_v34 = vld [vmem:[%s2533_s12 + $0xda8] sm:$0xff]  ;;  %v466_v35 = vld [vmem:[%s2533_s12 + $0x5a0] sm:$0xff] }
 0x17f   : > { %1554 = vmatpush1.msra.mxu0 %v322_v36  ;;  %1625 = vmatpush1.msra.mxu1 %v578_v37  ;;  %v722_v36 = vld [vmem:[%s2533_s12 + $0xda0] sm:$0xff]  ;;  %v459_v37 = vld [vmem:[%s2533_s12 + $0x568] sm:$0xff] }
 0x180   : > { %1555 = vmatprep.subr.mxu0 %v315_v38  ;;  %1626 = vmatprep.subr.mxu1 %v571_v39  ;;  %v715_v38 = vld [vmem:[%s2533_s12 + $0xd68] sm:$0xff]  ;;  %v458_v39 = vld [vmem:[%s2533_s12 + $0x560] sm:$0xff] }
 0x181   : > { %1556 = vmatpush1.msra.mxu0 %v314_v40  ;;  %1627 = vmatpush1.msra.mxu1 %v570_v41  ;;  %v714_v40 = vld [vmem:[%s2533_s12 + $0xd60] sm:$0xff]  ;;  %v451_v41 = vld [vmem:[%s2533_s12 + $0x528] sm:$0xff] }
 0x182   : > { %1557 = vmatprep.subr.mxu0 %v307_v42  ;;  %1628 = vmatprep.subr.mxu1 %v563_v43  ;;  %v707_v42 = vld [vmem:[%s2533_s12 + $0xd28] sm:$0xff]  ;;  %v450_v43 = vld [vmem:[%s2533_s12 + $0x520] sm:$0xff] }
 0x183   : > { %1558 = vmatpush1.msra.mxu0 %v306_v44  ;;  %1629 = vmatpush1.msra.mxu1 %v562_v45  ;;  %v706_v44 = vld [vmem:[%s2533_s12 + $0xd20] sm:$0xff]  ;;  %v443_v45 = vld [vmem:[%s2533_s12 + $0x4e8] sm:$0xff] }
 0x184   : > { %1559 = vmatprep.subr.mxu0 %v299_v46  ;;  %1630 = vmatprep.subr.mxu1 %v555_v47  ;;  %v699_v46 = vld [vmem:[%s2533_s12 + $0xce8] sm:$0xff]  ;;  %v442_v47 = vld [vmem:[%s2533_s12 + $0x4e0] sm:$0xff] }
 0x185   : > { %1560 = vmatpush1.msra.mxu0 %v298_v48  ;;  %1631 = vmatpush1.msra.mxu1 %v554_v49  ;;  %v698_v48 = vld [vmem:[%s2533_s12 + $0xce0] sm:$0xff]  ;;  %v435_v49 = vld [vmem:[%s2533_s12 + $0x4a8] sm:$0xff] }
 0x186   : > { %1561 = vmatprep.subr.mxu0 %v291_v50  ;;  %1632 = vmatprep.subr.mxu1 %v547_v51  ;;  %v691_v50 = vld [vmem:[%s2533_s12 + $0xca8] sm:$0xff]  ;;  %v434_v51 = vld [vmem:[%s2533_s12 + $0x4a0] sm:$0xff] }
 0x187   : > { %1562 = vmatpush1.msra.mxu0 %v290_v52  ;;  %1633 = vmatpush1.msra.mxu1 %v546_v53  ;;  %v690_v52 = vld [vmem:[%s2533_s12 + $0xca0] sm:$0xff]  ;;  %v427_v53 = vld [vmem:[%s2533_s12 + $0x468] sm:$0xff] }
 0x188   : > { %1563 = vmatprep.subr.mxu0 %v539_v54  ;;  %1634 = vmatprep.subr.mxu1 %v795_v55  ;;  %v683_v54 = vld [vmem:[%s2533_s12 + $0xc68] sm:$0xff]  ;;  %v426_v55 = vld [vmem:[%s2533_s12 + $0x460] sm:$0xff] }
 0x189   : > { %1564 = vmatpush2.msra.mxu0 %v538_v56  ;;  %1635 = vmatpush2.msra.mxu1 %v794_v57  ;;  %v682_v56 = vld [vmem:[%s2533_s12 + $0xc60] sm:$0xff]  ;;  %v419_v57 = vld [vmem:[%s2533_s12 + $0x428] sm:$0xff] }
 0x18a   : > { %1565 = vmatprep.subr.mxu0 %v531_v58  ;;  %1636 = vmatprep.subr.mxu1 %v787_v59  ;;  %v675_v58 = vld [vmem:[%s2533_s12 + $0xc28] sm:$0xff]  ;;  %v418_v59 = vld [vmem:[%s2533_s12 + $0x420] sm:$0xff] }
 0x18b   : > { %1566 = vmatpush2.msra.mxu0 %v530_v60  ;;  %1637 = vmatpush2.msra.mxu1 %v786_v61  ;;  %v674_v60 = vld [vmem:[%s2533_s12 + $0xc20] sm:$0xff]  ;;  %v923_v61 = vld [vmem:[%s2533_s12 + $0x13e8] sm:$0xff] }
 0x18c   : > { %1567 = vmatprep.subr.mxu0 %v523_v62  ;;  %1638 = vmatprep.subr.mxu1 %v779_v63  ;;  %v413_v62 = vld [vmem:[%s2533_s12 + $0x3f8] sm:$0xff]  ;;  %v922_v63 = vld [vmem:[%s2533_s12 + $0x13e0] sm:$0xff] }
 0x18d   : > { %1568 = vmatpush2.msra.mxu0 %v522_v0  ;;  %1639 = vmatpush2.msra.mxu1 %v778_v1  ;;  %v412_v0 = vld [vmem:[%s2533_s12 + $0x3f0] sm:$0xff]  ;;  %v915_v1 = vld [vmem:[%s2533_s12 + $0x13a8] sm:$0xff] }
 0x18e   : > { %1569 = vmatprep.subr.mxu0 %v515_v2  ;;  %1640 = vmatprep.subr.mxu1 %v771_v3  ;;  %v405_v2 = vld [vmem:[%s2533_s12 + $0x3b8] sm:$0xff]  ;;  %v914_v3 = vld [vmem:[%s2533_s12 + $0x13a0] sm:$0xff] }
 0x18f   : > { %1570 = vmatpush2.msra.mxu0 %v514_v4  ;;  %1641 = vmatpush2.msra.mxu1 %v770_v5  ;;  %v404_v4 = vld [vmem:[%s2533_s12 + $0x3b0] sm:$0xff]  ;;  %v907_v5 = vld [vmem:[%s2533_s12 + $0x1368] sm:$0xff] }
 0x190   : > { %1571 = vmatprep.subr.mxu0 %v507_v6  ;;  %1642 = vmatprep.subr.mxu1 %v763_v7  ;;  %v397_v6 = vld [vmem:[%s2533_s12 + $0x378] sm:$0xff]  ;;  %v906_v7 = vld [vmem:[%s2533_s12 + $0x1360] sm:$0xff] }
 0x191   : > { %1572 = vmatpush2.msra.mxu0 %v506_v9  ;;  %1643 = vmatpush2.msra.mxu1 %v762_v10  ;;  %v396_v9 = vld [vmem:[%s2533_s12 + $0x370] sm:$0xff]  ;;  %v899_v10 = vld [vmem:[%s2533_s12 + $0x1328] sm:$0xff] }
 0x192   : > { %1573 = vmatprep.subr.mxu0 %v499_v11  ;;  %1644 = vmatprep.subr.mxu1 %v755_v12  ;;  %v389_v11 = vld [vmem:[%s2533_s12 + $0x338] sm:$0xff]  ;;  %v898_v12 = vld [vmem:[%s2533_s12 + $0x1320] sm:$0xff] }
 0x193   : > { %1574 = vmatpush2.msra.mxu0 %v498_v13  ;;  %1645 = vmatpush2.msra.mxu1 %v754_v14  ;;  %v891_v13 = vld [vmem:[%s2533_s12 + $0x12e8] sm:$0xff]  ;;  %v381_v14 = vld [vmem:[%s2533_s12 + $0x2f8] sm:$0xff] }
 0x194   : > { %1575 = vmatprep.subr.mxu0 %v491_v20  ;;  %1646 = vmatprep.subr.mxu1 %v747_v21  ;;  %v890_v20 = vld [vmem:[%s2533_s12 + $0x12e0] sm:$0xff]  ;;  %v380_v21 = vld [vmem:[%s2533_s12 + $0x2f0] sm:$0xff] }
 0x195   : > { %1576 = vmatpush2.msra.mxu0 %v490_v22  ;;  %1647 = vmatpush2.msra.mxu1 %v746_v24  ;;  %v883_v22 = vld [vmem:[%s2533_s12 + $0x12a8] sm:$0xff]  ;;  %v373_v24 = vld [vmem:[%s2533_s12 + $0x2b8] sm:$0xff] }
 0x196   : > { %1577 = vmatprep.subr.mxu0 %v483_v25  ;;  %1648 = vmatprep.subr.mxu1 %v739_v26  ;;  %v882_v25 = vld [vmem:[%s2533_s12 + $0x12a0] sm:$0xff]  ;;  %v372_v26 = vld [vmem:[%s2533_s12 + $0x2b0] sm:$0xff] }
 0x197   : > { %1578 = vmatpush2.msra.mxu0 %v482_v27  ;;  %1649 = vmatpush2.msra.mxu1 %v738_v28  ;;  %v875_v27 = vld [vmem:[%s2533_s12 + $0x1268] sm:$0xff]  ;;  %v365_v28 = vld [vmem:[%s2533_s12 + $0x278] sm:$0xff] }
 0x198   : > { %1579 = vmatprep.subr.mxu0 %v475_v29  ;;  %1650 = vmatprep.subr.mxu1 %v731_v30  ;;  %v874_v29 = vld [vmem:[%s2533_s12 + $0x1260] sm:$0xff]  ;;  %v364_v30 = vld [vmem:[%s2533_s12 + $0x270] sm:$0xff] }
 0x199   : > { %1580 = vmatpush2.msra.mxu0 %v474_v31  ;;  %1651 = vmatpush2.msra.mxu1 %v730_v32  ;;  %v867_v31 = vld [vmem:[%s2533_s12 + $0x1228] sm:$0xff]  ;;  %v357_v32 = vld [vmem:[%s2533_s12 + $0x238] sm:$0xff] }
 0x19a   : > { %1581 = vmatprep.subr.mxu0 %v467_v33  ;;  %1652 = vmatprep.subr.mxu1 %v723_v34  ;;  %v866_v33 = vld [vmem:[%s2533_s12 + $0x1220] sm:$0xff]  ;;  %v356_v34 = vld [vmem:[%s2533_s12 + $0x230] sm:$0xff] }
 0x19b   : > { %1582 = vmatpush2.msra.mxu0 %v466_v35  ;;  %1653 = vmatpush2.msra.mxu1 %v722_v36  ;;  %v859_v35 = vld [vmem:[%s2533_s12 + $0x11e8] sm:$0xff]  ;;  %v349_v36 = vld [vmem:[%s2533_s12 + $0x1f8] sm:$0xff] }
 0x19c   : > { %1583 = vmatprep.subr.mxu0 %v459_v37  ;;  %1654 = vmatprep.subr.mxu1 %v715_v38  ;;  %v858_v37 = vld [vmem:[%s2533_s12 + $0x11e0] sm:$0xff]  ;;  %v348_v38 = vld [vmem:[%s2533_s12 + $0x1f0] sm:$0xff] }
 0x19d   : > { %1584 = vmatpush2.msra.mxu0 %v458_v39  ;;  %1655 = vmatpush2.msra.mxu1 %v714_v40  ;;  %v851_v39 = vld [vmem:[%s2533_s12 + $0x11a8] sm:$0xff]  ;;  %v341_v40 = vld [vmem:[%s2533_s12 + $0x1b8] sm:$0xff] }
 0x19e   : > { %1585 = vmatprep.subr.mxu0 %v451_v41  ;;  %1656 = vmatprep.subr.mxu1 %v707_v42  ;;  %v850_v41 = vld [vmem:[%s2533_s12 + $0x11a0] sm:$0xff]  ;;  %v340_v42 = vld [vmem:[%s2533_s12 + $0x1b0] sm:$0xff] }
 0x19f   : > { %1586 = vmatpush2.msra.mxu0 %v450_v43  ;;  %1657 = vmatpush2.msra.mxu1 %v706_v44  ;;  %v843_v43 = vld [vmem:[%s2533_s12 + $0x1168] sm:$0xff]  ;;  %v333_v44 = vld [vmem:[%s2533_s12 + $0x178] sm:$0xff] }
 0x1a0   : > { %1587 = vmatprep.subr.mxu0 %v443_v45  ;;  %1658 = vmatprep.subr.mxu1 %v699_v46  ;;  %v842_v45 = vld [vmem:[%s2533_s12 + $0x1160] sm:$0xff]  ;;  %v332_v46 = vld [vmem:[%s2533_s12 + $0x170] sm:$0xff] }
 0x1a1   : > { %1588 = vmatpush2.msra.mxu0 %v442_v47  ;;  %1659 = vmatpush2.msra.mxu1 %v698_v48  ;;  %v835_v47 = vld [vmem:[%s2533_s12 + $0x1128] sm:$0xff]  ;;  %v325_v48 = vld [vmem:[%s2533_s12 + $0x138] sm:$0xff] }
 0x1a2   : > { %1589 = vmatprep.subr.mxu0 %v435_v49  ;;  %1660 = vmatprep.subr.mxu1 %v691_v50  ;;  %v834_v49 = vld [vmem:[%s2533_s12 + $0x1120] sm:$0xff]  ;;  %v324_v50 = vld [vmem:[%s2533_s12 + $0x130] sm:$0xff] }
 0x1a3   : > { %1590 = vmatpush2.msra.mxu0 %v434_v51  ;;  %1661 = vmatpush2.msra.mxu1 %v690_v52  ;;  %v827_v51 = vld [vmem:[%s2533_s12 + $0x10e8] sm:$0xff]  ;;  %v317_v52 = vld [vmem:[%s2533_s12 + $0xf8] sm:$0xff] }
 0x1a4   : > { %1591 = vmatprep.subr.mxu0 %v427_v53  ;;  %1662 = vmatprep.subr.mxu1 %v683_v54  ;;  %v826_v53 = vld [vmem:[%s2533_s12 + $0x10e0] sm:$0xff]  ;;  %v316_v54 = vld [vmem:[%s2533_s12 + $0xf0] sm:$0xff] }
 0x1a5   : > { %1592 = vmatpush2.msra.mxu0 %v426_v55  ;;  %1663 = vmatpush2.msra.mxu1 %v682_v56  ;;  %v819_v55 = vld [vmem:[%s2533_s12 + $0x10a8] sm:$0xff]  ;;  %v309_v56 = vld [vmem:[%s2533_s12 + $0xb8] sm:$0xff] }
 0x1a6   : > { %1593 = vmatprep.subr.mxu0 %v419_v57  ;;  %1664 = vmatprep.subr.mxu1 %v675_v58  ;;  %v818_v57 = vld [vmem:[%s2533_s12 + $0x10a0] sm:$0xff]  ;;  %v308_v58 = vld [vmem:[%s2533_s12 + $0xb0] sm:$0xff] }
 0x1a7   : > { %1594 = vmatpush2.msra.mxu0 %v418_v59  ;;  %1665 = vmatpush2.msra.mxu1 %v674_v60  ;;  %v811_v59 = vld [vmem:[%s2533_s12 + $0x1068] sm:$0xff]  ;;  %v301_v60 = vld [vmem:[%s2533_s12 + $0x78] sm:$0xff] }
 0x1a8   : > { %1596 = vmatmul.mubr.f32.vlgmr.msra.gmra.mxu0 %v2675_v15  ;;  %1667 = vmatmul.mubr.f32.vlgmr.msra.gmra.mxu1 %v2677_v16 }
 0x1a9   : > { %1673 = vmatprep.subr.mxu0 %v923_v61  ;;  %1744 = vmatprep.subr.mxu1 %v413_v62  ;;  %v810_v61 = vld [vmem:[%s2533_s12 + $0x1060] sm:$0xff]  ;;  %v300_v62 = vld [vmem:[%s2533_s12 + $0x70] sm:$0xff] }
 0x1aa   : > { %1674 = vmatpush1.msra.mxu0 %v922_v63  ;;  %1737 = vmatprep.mubr.f32.mxu0 %v2698_v23  ;;  %v803_v63 = vld [vmem:[%s2533_s12 + $0x1028] sm:$0xff] }
 0x1ab   : > { %1745 = vmatpush1.msra.mxu1 %v412_v0  ;;  %1808 = vmatprep.mubr.f32.mxu1 %v2683_v18  ;;  %v388_v18 = vld [vmem:[%s2533_s12 + $0x330] sm:$0xff]  ;;  %v293_v0 = vld [vmem:[%s2533_s12 + $0x38] sm:$0xff] }
 0x1ac   : > { %1675 = vmatprep.subr.mxu0 %v915_v1  ;;  %1746 = vmatprep.subr.mxu1 %v405_v2  ;;  %v802_v1 = vld [vmem:[%s2533_s12 + $0x1020] sm:$0xff]  ;;  %v292_v2 = vld [vmem:[%s2533_s12 + $0x30] sm:$0xff] }
 0x1ad   : > { %1676 = vmatpush1.msra.mxu0 %v914_v3  ;;  %1747 = vmatpush1.msra.mxu1 %v404_v4  ;;  %v1051_v3 = vld [vmem:[%s2533_s12 + $0x17e8] sm:$0xff]  ;;  %v541_v4 = vld [vmem:[%s2533_s12 + $0x7f8] sm:$0xff] }
 0x1ae   : > { %1677 = vmatprep.subr.mxu0 %v907_v5  ;;  %1748 = vmatprep.subr.mxu1 %v397_v6  ;;  %v1050_v5 = vld [vmem:[%s2533_s12 + $0x17e0] sm:$0xff]  ;;  %v540_v6 = vld [vmem:[%s2533_s12 + $0x7f0] sm:$0xff] }
 0x1af   : > { %1678 = vmatpush1.msra.mxu0 %v906_v7  ;;  %1749 = vmatpush1.msra.mxu1 %v396_v9  ;;  %v1043_v7 = vld [vmem:[%s2533_s12 + $0x17a8] sm:$0xff]  ;;  %v533_v9 = vld [vmem:[%s2533_s12 + $0x7b8] sm:$0xff] }
 0x1b0   : > { %1679 = vmatprep.subr.mxu0 %v899_v10  ;;  %1750 = vmatprep.subr.mxu1 %v389_v11  ;;  %v1042_v10 = vld [vmem:[%s2533_s12 + $0x17a0] sm:$0xff]  ;;  %v532_v11 = vld [vmem:[%s2533_s12 + $0x7b0] sm:$0xff] }
 0x1b1   : > { %1680 = vmatpush1.msra.mxu0 %v898_v12  ;;  %1751 = vmatpush1.msra.mxu1 %v388_v18  ;;  %v1035_v12 = vld [vmem:[%s2533_s12 + $0x1768] sm:$0xff]  ;;  %v525_v18 = vld [vmem:[%s2533_s12 + $0x778] sm:$0xff] }
 0x1b2   : > { %1681 = vmatprep.subr.mxu0 %v891_v13  ;;  %1752 = vmatprep.subr.mxu1 %v381_v14  ;;  %v1034_v13 = vld [vmem:[%s2533_s12 + $0x1760] sm:$0xff]  ;;  %v524_v14 = vld [vmem:[%s2533_s12 + $0x770] sm:$0xff] }
 0x1b3   : > { %1682 = vmatpush1.msra.mxu0 %v890_v20  ;;  %1753 = vmatpush1.msra.mxu1 %v380_v21  ;;  %v1027_v20 = vld [vmem:[%s2533_s12 + $0x1728] sm:$0xff]  ;;  %v517_v21 = vld [vmem:[%s2533_s12 + $0x738] sm:$0xff] }
 0x1b4   : > { %1683 = vmatprep.subr.mxu0 %v883_v22  ;;  %1754 = vmatprep.subr.mxu1 %v373_v24  ;;  %v1026_v22 = vld [vmem:[%s2533_s12 + $0x1720] sm:$0xff]  ;;  %v516_v24 = vld [vmem:[%s2533_s12 + $0x730] sm:$0xff] }
 0x1b5   : > { %1684 = vmatpush1.msra.mxu0 %v882_v25  ;;  %1755 = vmatpush1.msra.mxu1 %v372_v26  ;;  %v1019_v25 = vld [vmem:[%s2533_s12 + $0x16e8] sm:$0xff]  ;;  %v509_v26 = vld [vmem:[%s2533_s12 + $0x6f8] sm:$0xff] }
 0x1b6   : > { %1685 = vmatprep.subr.mxu0 %v875_v27  ;;  %1756 = vmatprep.subr.mxu1 %v365_v28  ;;  %v1018_v27 = vld [vmem:[%s2533_s12 + $0x16e0] sm:$0xff]  ;;  %v508_v28 = vld [vmem:[%s2533_s12 + $0x6f0] sm:$0xff] }
 0x1b7   : > { %1686 = vmatpush1.msra.mxu0 %v874_v29  ;;  %1757 = vmatpush1.msra.mxu1 %v364_v30  ;;  %v1011_v29 = vld [vmem:[%s2533_s12 + $0x16a8] sm:$0xff]  ;;  %v501_v30 = vld [vmem:[%s2533_s12 + $0x6b8] sm:$0xff] }
 0x1b8   : > { %1687 = vmatprep.subr.mxu0 %v867_v31  ;;  %1758 = vmatprep.subr.mxu1 %v357_v32  ;;  %v1010_v31 = vld [vmem:[%s2533_s12 + $0x16a0] sm:$0xff]  ;;  %v500_v32 = vld [vmem:[%s2533_s12 + $0x6b0] sm:$0xff] }
 0x1b9   : > { %1688 = vmatpush1.msra.mxu0 %v866_v33  ;;  %1759 = vmatpush1.msra.mxu1 %v356_v34  ;;  %v1003_v33 = vld [vmem:[%s2533_s12 + $0x1668] sm:$0xff]  ;;  %v493_v34 = vld [vmem:[%s2533_s12 + $0x678] sm:$0xff] }
 0x1ba   : > { %1689 = vmatprep.subr.mxu0 %v859_v35  ;;  %1760 = vmatprep.subr.mxu1 %v349_v36  ;;  %v1002_v35 = vld [vmem:[%s2533_s12 + $0x1660] sm:$0xff]  ;;  %v492_v36 = vld [vmem:[%s2533_s12 + $0x670] sm:$0xff] }
 0x1bb   : > { %1690 = vmatpush1.msra.mxu0 %v858_v37  ;;  %1761 = vmatpush1.msra.mxu1 %v348_v38  ;;  %v995_v37 = vld [vmem:[%s2533_s12 + $0x1628] sm:$0xff]  ;;  %v485_v38 = vld [vmem:[%s2533_s12 + $0x638] sm:$0xff] }
 0x1bc   : > { %1691 = vmatprep.subr.mxu0 %v851_v39  ;;  %1762 = vmatprep.subr.mxu1 %v341_v40  ;;  %v994_v39 = vld [vmem:[%s2533_s12 + $0x1620] sm:$0xff]  ;;  %v484_v40 = vld [vmem:[%s2533_s12 + $0x630] sm:$0xff] }
 0x1bd   : > { %1692 = vmatpush1.msra.mxu0 %v850_v41  ;;  %1763 = vmatpush1.msra.mxu1 %v340_v42  ;;  %v987_v41 = vld [vmem:[%s2533_s12 + $0x15e8] sm:$0xff]  ;;  %v477_v42 = vld [vmem:[%s2533_s12 + $0x5f8] sm:$0xff] }
 0x1be   : > { %1693 = vmatprep.subr.mxu0 %v843_v43  ;;  %1764 = vmatprep.subr.mxu1 %v333_v44  ;;  %v986_v43 = vld [vmem:[%s2533_s12 + $0x15e0] sm:$0xff]  ;;  %v476_v44 = vld [vmem:[%s2533_s12 + $0x5f0] sm:$0xff] }
 0x1bf   : > { %1694 = vmatpush1.msra.mxu0 %v842_v45  ;;  %1765 = vmatpush1.msra.mxu1 %v332_v46  ;;  %v1058_v45 = vsub.s32 0, %v2672_v8  ;;  %v1062_v46 = vsub.s32 1, %v2672_v8 }
 0x1c0   : > { %1695 = vmatprep.subr.mxu0 %v835_v47  ;;  %1766 = vmatprep.subr.mxu1 %v325_v48  ;;  %v979_v47 = vld [vmem:[%s2533_s12 + $0x15a8] sm:$0xff]  ;;  %v469_v48 = vld [vmem:[%s2533_s12 + $0x5b8] sm:$0xff] }
 0x1c1   : > { %1696 = vmatpush1.msra.mxu0 %v834_v49  ;;  %1767 = vmatpush1.msra.mxu1 %v324_v50  ;;  %v3198_v49 = vld [vmem:[%s234_s20] sm:$0xff]  ;;  %v1171_v50 = vpop.f32.mrf.mxu0 }
 0x1c2   : > { %1697 = vmatprep.subr.mxu0 %v827_v51  ;;  %1768 = vmatprep.subr.mxu1 %v317_v52  ;;  %v978_v51 = vld [vmem:[%s2533_s12 + $0x15a0] sm:$0xff]  ;;  %v468_v52 = vld [vmem:[%s2533_s12 + $0x5b0] sm:$0xff] }
 0x1c3   : > { %1698 = vmatpush1.msra.mxu0 %v826_v53  ;;  %1769 = vmatpush1.msra.mxu1 %v316_v54  ;;  %v971_v53 = vld [vmem:[%s2533_s12 + $0x1568] sm:$0xff]  ;;  %v461_v54 = vld [vmem:[%s2533_s12 + $0x578] sm:$0xff] }
 0x1c4   : > { %1699 = vmatprep.subr.mxu0 %v819_v55  ;;  %1770 = vmatprep.subr.mxu1 %v309_v56  ;;  %v970_v55 = vld [vmem:[%s2533_s12 + $0x1560] sm:$0xff]  ;;  %v460_v56 = vld [vmem:[%s2533_s12 + $0x570] sm:$0xff] }
 0x1c5   : > { %1700 = vmatpush1.msra.mxu0 %v818_v57  ;;  %1771 = vmatpush1.msra.mxu1 %v308_v58  ;;  %v1059_v57 = vrot.slane %v3198_v49, %v1058_v45  ;;  %v1063_v58 = vrot.slane %v3198_v49, %v1062_v46  ;;  %v644_v45 = vld [vmem:[%s2533_s12 + $0xb30] sm:$0xff]  ;;  %v637_v46 = vld [vmem:[%s2533_s12 + $0xaf8] sm:$0xff] }
 0x1c6   : > { %1701 = vmatprep.subr.mxu0 %v811_v59  ;;  %1772 = vmatprep.subr.mxu1 %v301_v60  ;;  %v963_v59 = vld [vmem:[%s2533_s12 + $0x1528] sm:$0xff]  ;;  %v453_v60 = vld [vmem:[%s2533_s12 + $0x538] sm:$0xff] }
 0x1c7   : > { %1702 = vmatpush1.msra.mxu0 %v810_v61  ;;  %1773 = vmatpush1.msra.mxu1 %v300_v62  ;;  %v1173_v61 = vpop.f32.mrf.mxu0  ;;  %v962_v62 = vld [vmem:[%s2533_s12 + $0x1520] sm:$0xff] }
 0x1c8   : > { %1703 = vmatprep.subr.mxu0 %v803_v63  ;;  %1774 = vmatprep.subr.mxu1 %v293_v0  ;;  %v452_v63 = vld [vmem:[%s2533_s12 + $0x530] sm:$0xff]  ;;  %v955_v0 = vld [vmem:[%s2533_s12 + $0x14e8] sm:$0xff] }
 0x1c9   : > { %1704 = vmatpush1.msra.mxu0 %v802_v1  ;;  %1775 = vmatpush1.msra.mxu1 %v292_v2  ;;  %v445_v1 = vld [vmem:[%s2533_s12 + $0x4f8] sm:$0xff]  ;;  %v1242_v2 = vpop.f32.mrf.mxu1 }
 0x1ca   : > { %1705 = vmatprep.subr.mxu0 %v1051_v3  ;;  %1776 = vmatprep.subr.mxu1 %v541_v4  ;;  %v954_v3 = vld [vmem:[%s2533_s12 + $0x14e0] sm:$0xff]  ;;  %v444_v4 = vld [vmem:[%s2533_s12 + $0x4f0] sm:$0xff] }
 0x1cb   : > { %1706 = vmatpush2.msra.mxu0 %v1050_v5  ;;  %1777 = vmatpush2.msra.mxu1 %v540_v6  ;;  %v1172_v5 = vadd.f32 %v1171_v50, %v1059_v57  ;;  %v1174_v6 = vadd.f32 %v1173_v61, %v1063_v58  ;;  %v892_v50 = vld [vmem:[%s2533_s12 + $0x12f0] sm:$0xff] }
 0x1cc   : > { %1707 = vmatprep.subr.mxu0 %v1043_v7  ;;  %1778 = vmatprep.subr.mxu1 %v533_v9  ;;  %v947_v7 = vld [vmem:[%s2533_s12 + $0x14a8] sm:$0xff]  ;;  %v437_v9 = vld [vmem:[%s2533_s12 + $0x4b8] sm:$0xff]  ;;  %v620_v57 = vld [vmem:[%s2533_s12 + $0xa70] sm:$0xff] }
 0x1cd   : > { %1708 = vmatpush2.msra.mxu0 %v1042_v10  ;;  %1779 = vmatpush2.msra.mxu1 %v532_v11  ;;  %v946_v10 = vld [vmem:[%s2533_s12 + $0x14a0] sm:$0xff]  ;;  %v436_v11 = vld [vmem:[%s2533_s12 + $0x4b0] sm:$0xff] }
 0x1ce   : > { %1709 = vmatprep.subr.mxu0 %v1035_v12  ;;  %1780 = vmatprep.subr.mxu1 %v525_v18  ;;  %v939_v12 = vld [vmem:[%s2533_s12 + $0x1468] sm:$0xff]  ;;  %v429_v18 = vld [vmem:[%s2533_s12 + $0x478] sm:$0xff]  ;;  %v876_v58 = vld [vmem:[%s2533_s12 + $0x1270] sm:$0xff] }
 0x1cf   : > { %1710 = vmatpush2.msra.mxu0 %v1034_v13  ;;  %1781 = vmatpush2.msra.mxu1 %v524_v14  ;;  %v1244_v13 = vpop.f32.mrf.mxu1  ;;  %v938_v14 = vld [vmem:[%s2533_s12 + $0x1460] sm:$0xff]  ;;  %v612_v61 = vld [vmem:[%s2533_s12 + $0xa30] sm:$0xff] }
 0x1d0   : > { %1711 = vmatprep.subr.mxu0 %v1027_v20  ;;  %1782 = vmatprep.subr.mxu1 %v517_v21  ;;  %v428_v20 = vld [vmem:[%s2533_s12 + $0x470] sm:$0xff] }
 0x1d1   : > { %1712 = vmatpush2.msra.mxu0 %v1026_v22  ;;  %1783 = vmatpush2.msra.mxu1 %v516_v24  ;;  %v1243_v22 = vadd.f32 %v1242_v2, %v1172_v5  ;;  %v1245_v24 = vadd.f32 %v1244_v13, %v1174_v6  ;;  %v860_v2 = vld [vmem:[%s2533_s12 + $0x11f0] sm:$0xff] }
 0x1d2   : > { %1713 = vmatprep.subr.mxu0 %v1019_v25  ;;  %1784 = vmatprep.subr.mxu1 %v509_v26  ;;  %v931_v25 = vld [vmem:[%s2533_s12 + $0x1428] sm:$0xff]  ;;  %v421_v26 = vld [vmem:[%s2533_s12 + $0x438] sm:$0xff]  ;;  %v596_v5 = vld [vmem:[%s2533_s12 + $0x9b0] sm:$0xff] }
 0x1d3   : > { %1714 = vmatpush2.msra.mxu0 %v1018_v27  ;;  %1785 = vmatpush2.msra.mxu1 %v508_v28  ;;  %v930_v27 = vld [vmem:[%s2533_s12 + $0x1420] sm:$0xff]  ;;  %v420_v28 = vld [vmem:[%s2533_s12 + $0x430] sm:$0xff] }
 0x1d4   : > { %1715 = vmatprep.subr.mxu0 %v1011_v29  ;;  %1786 = vmatprep.subr.mxu1 %v501_v30  ;;  %v852_v6 = vld [vmem:[%s2533_s12 + $0x11b0] sm:$0xff] }
 0x1d5   : > { %1716 = vmatpush2.msra.mxu0 %v1010_v31  ;;  %1787 = vmatpush2.msra.mxu1 %v500_v32  ;;  %v669_v32 = vld [vmem:[%s2533_s12 + $0xbf8] sm:$0xff]  ;;  %v580_v13 = vld [vmem:[%s2533_s12 + $0x930] sm:$0xff] }
 0x1d6   : > { %1717 = vmatprep.subr.mxu0 %v1003_v33  ;;  %1788 = vmatprep.subr.mxu1 %v493_v34  ;;  %v925_v33 = vld [vmem:[%s2533_s12 + $0x13f8] sm:$0xff]  ;;  %v668_v34 = vld [vmem:[%s2533_s12 + $0xbf0] sm:$0xff] }
 0x1d7   : > { %1718 = vmatpush2.msra.mxu0 %v1002_v35  ;;  %1789 = vmatpush2.msra.mxu1 %v492_v36  ;;  %v924_v36 = vld [vmem:[%s2533_s12 + $0x13f0] sm:$0xff] }
 0x1d8   : > { %1719 = vmatprep.subr.mxu0 %v995_v37  ;;  %1790 = vmatprep.subr.mxu1 %v485_v38  ;;  %v661_v37 = vld [vmem:[%s2533_s12 + $0xbb8] sm:$0xff] }
 0x1d9   : > { %1720 = vmatpush2.msra.mxu0 %v994_v39  ;;  %1791 = vmatpush2.msra.mxu1 %v484_v40  ;;  %v917_v38 = vld [vmem:[%s2533_s12 + $0x13b8] sm:$0xff]  ;;  %v660_v39 = vld [vmem:[%s2533_s12 + $0xbb0] sm:$0xff] }
 0x1da   : > { %1721 = vmatprep.subr.mxu0 %v987_v41  ;;  %1792 = vmatprep.subr.mxu1 %v477_v42  ;;  %v916_v40 = vld [vmem:[%s2533_s12 + $0x13b0] sm:$0xff]  ;;  %v909_v41 = vld [vmem:[%s2533_s12 + $0x1378] sm:$0xff] }
 0x1db   : > { %1722 = vmatpush2.msra.mxu0 %v986_v43  ;;  %1793 = vmatpush2.msra.mxu1 %v476_v44  ;;  %v652_v42 = vld [vmem:[%s2533_s12 + $0xb70] sm:$0xff]  ;;  %v901_v44 = vld [vmem:[%s2533_s12 + $0x1338] sm:$0xff] }
 0x1dc   : > { %1723 = vmatprep.subr.mxu0 %v979_v47  ;;  %1794 = vmatprep.subr.mxu1 %v469_v48  ;;  %v908_v43 = vld [vmem:[%s2533_s12 + $0x1370] sm:$0xff]  ;;  %v893_v47 = vld [vmem:[%s2533_s12 + $0x12f8] sm:$0xff] }
 0x1dd   : > { %1724 = vmatpush2.msra.mxu0 %v978_v51  ;;  %1795 = vmatpush2.msra.mxu1 %v468_v52  ;;  %v636_v48 = vld [vmem:[%s2533_s12 + $0xaf0] sm:$0xff]  ;;  %v629_v51 = vld [vmem:[%s2533_s12 + $0xab8] sm:$0xff] }
 0x1de   : > { %1725 = vmatprep.subr.mxu0 %v971_v53  ;;  %1796 = vmatprep.subr.mxu1 %v461_v54  ;;  %v885_v52 = vld [vmem:[%s2533_s12 + $0x12b8] sm:$0xff]  ;;  %v628_v53 = vld [vmem:[%s2533_s12 + $0xab0] sm:$0xff] }
 0x1df   : > { %1726 = vmatpush2.msra.mxu0 %v970_v55  ;;  %1797 = vmatpush2.msra.mxu1 %v460_v56  ;;  %v884_v54 = vld [vmem:[%s2533_s12 + $0x12b0] sm:$0xff]  ;;  %v621_v55 = vld [vmem:[%s2533_s12 + $0xa78] sm:$0xff] }
 0x1e0   : > { %1727 = vmatprep.subr.mxu0 %v963_v59  ;;  %1798 = vmatprep.subr.mxu1 %v453_v60  ;;  %v877_v56 = vld [vmem:[%s2533_s12 + $0x1278] sm:$0xff] }
 0x1e1   : > { %1728 = vmatpush2.msra.mxu0 %v962_v62  ;;  %1799 = vmatpush2.msra.mxu1 %v452_v63  ;;  %v613_v59 = vld [vmem:[%s2533_s12 + $0xa38] sm:$0xff]  ;;  %v868_v62 = vld [vmem:[%s2533_s12 + $0x1230] sm:$0xff] }
 0x1e2   : > { %1729 = vmatprep.subr.mxu0 %v955_v0  ;;  %1800 = vmatprep.subr.mxu1 %v445_v1  ;;  %v869_v60 = vld [vmem:[%s2533_s12 + $0x1238] sm:$0xff]  ;;  %v604_v1 = vld [vmem:[%s2533_s12 + $0x9f0] sm:$0xff] }
 0x1e3   : > { %1730 = vmatpush2.msra.mxu0 %v954_v3  ;;  %1801 = vmatpush2.msra.mxu1 %v444_v4  ;;  %v605_v63 = vld [vmem:[%s2533_s12 + $0x9f8] sm:$0xff] }
 0x1e4   : > { %1731 = vmatprep.subr.mxu0 %v947_v7  ;;  %1802 = vmatprep.subr.mxu1 %v437_v9  ;;  %v1313_v21 = vpop.f32.mrf.mxu0  ;;  %v861_v0 = vld [vmem:[%s2533_s12 + $0x11f8] sm:$0xff] }
 0x1e5   : > { %1732 = vmatpush2.msra.mxu0 %v946_v10  ;;  %1803 = vmatpush2.msra.mxu1 %v436_v11  ;;  %v1314_v30 = vadd.f32 %v1313_v21, %v1243_v22  ;;  %v597_v3 = vld [vmem:[%s2533_s12 + $0x9b8] sm:$0xff]  ;;  %v588_v10 = vld [vmem:[%s2533_s12 + $0x970] sm:$0xff] }
 0x1e6   : > { %1733 = vmatprep.subr.mxu0 %v939_v12  ;;  %1804 = vmatprep.subr.mxu1 %v429_v18  ;;  %v1315_v29 = vpop.f32.mrf.mxu0  ;;  %v853_v4 = vld [vmem:[%s2533_s12 + $0x11b8] sm:$0xff]  ;;  %v844_v11 = vld [vmem:[%s2533_s12 + $0x1170] sm:$0xff] }
 0x1e7   : > { %1734 = vmatpush2.msra.mxu0 %v938_v14  ;;  %1805 = vmatpush2.msra.mxu1 %v428_v20  ;;  %v1316_v31 = vadd.f32 %v1315_v29, %v1245_v24  ;;  %v589_v7 = vld [vmem:[%s2533_s12 + $0x978] sm:$0xff]  ;;  %v836_v14 = vld [vmem:[%s2533_s12 + $0x1130] sm:$0xff] }
 0x1e8   : > { %1735 = vmatprep.subr.mxu0 %v931_v25  ;;  %1806 = vmatprep.subr.mxu1 %v421_v26  ;;  %v845_v9 = vld [vmem:[%s2533_s12 + $0x1178] sm:$0xff]  ;;  %v572_v22 = vld [vmem:[%s2533_s12 + $0x8f0] sm:$0xff] }
 0x1e9   : > { %1736 = vmatpush2.msra.mxu0 %v930_v27  ;;  %1807 = vmatpush2.msra.mxu1 %v420_v28  ;;  %v1965_v35 = vcombine.low %v1314_v30, %v1316_v31  ;;  %v581_v12 = vld [vmem:[%s2533_s12 + $0x938] sm:$0xff]  ;;  %v828_v24 = vld [vmem:[%s2533_s12 + $0x10f0] sm:$0xff] }
 0x1ea   : > { %1738 = vmatmul.mubr.f32.vlgmr.msra.gmra.mxu0 %v2679_v17  ;;  %1809 = vmatmul.mubr.f32.vlgmr.msra.gmra.mxu1 %v2675_v15  ;;  %v653_v15 = vld [vmem:[%s2533_s12 + $0xb78] sm:$0xff]  ;;  %v564_v27 = vld [vmem:[%s2533_s12 + $0x8b0] sm:$0xff] }
 0x1eb   : > { %1815 = vmatprep.subr.mxu0 %v669_v32  ;;  %1886 = vmatprep.subr.mxu1 %v925_v33  ;;  %1973 = vst [vmem:[%s3235_s13] sm:$0xff] %v1965_v35  ;;  %v837_v18 = vld [vmem:[%s2533_s12 + $0x1138] sm:$0xff]  ;;  %v820_v28 = vld [vmem:[%s2533_s12 + $0x10b0] sm:$0xff] }
 0x1ec   : > { %1816 = vmatpush1.msra.mxu0 %v668_v34  ;;  %1879 = vmatprep.mubr.f32.mxu0 %v2687_v19  ;;  %v645_v19 = vld [vmem:[%s2533_s12 + $0xb38] sm:$0xff]  ;;  %v556_v31 = vld [vmem:[%s2533_s12 + $0x870] sm:$0xff] }
 0x1ed   : > { %1887 = vmatpush1.msra.mxu1 %v924_v36  ;;  %1950 = vmatprep.mubr.f32.mxu1 %v2698_v23  ;;  %v900_v23 = vld [vmem:[%s2533_s12 + $0x1330] sm:$0xff]  ;;  %v573_v20 = vld [vmem:[%s2533_s12 + $0x8f8] sm:$0xff] }
 0x1ee   : > { %1817 = vmatprep.subr.mxu0 %v661_v37  ;;  %1888 = vmatprep.subr.mxu1 %v917_v38  ;;  %v829_v21 = vld [vmem:[%s2533_s12 + $0x10f8] sm:$0xff]  ;;  %v812_v32 = vld [vmem:[%s2533_s12 + $0x1070] sm:$0xff] }
 0x1ef   : > { %1818 = vmatpush1.msra.mxu0 %v660_v39  ;;  %1889 = vmatpush1.msra.mxu1 %v916_v40  ;;  %v565_v25 = vld [vmem:[%s2533_s12 + $0x8b8] sm:$0xff]  ;;  %v548_v35 = vld [vmem:[%s2533_s12 + $0x830] sm:$0xff] }
 0x1f0   : > { %1819 = vmatprep.subr.mxu0 %v653_v15  ;;  %1890 = vmatprep.subr.mxu1 %v909_v41  ;;  %v821_v26 = vld [vmem:[%s2533_s12 + $0x10b8] sm:$0xff]  ;;  %v804_v36 = vld [vmem:[%s2533_s12 + $0x1030] sm:$0xff] }
 0x1f1   : > { %1820 = vmatpush1.msra.mxu0 %v652_v42  ;;  %1891 = vmatpush1.msra.mxu1 %v908_v43  ;;  %v557_v29 = vld [vmem:[%s2533_s12 + $0x878] sm:$0xff]  ;;  %v796_v39 = vld [vmem:[%s2533_s12 + $0xff0] sm:$0xff] }
 0x1f2   : > { %1821 = vmatprep.subr.mxu0 %v645_v19  ;;  %1892 = vmatprep.subr.mxu1 %v901_v44  ;;  %v813_v30 = vld [vmem:[%s2533_s12 + $0x1078] sm:$0xff]  ;;  %v1052_v40 = vld [vmem:[%s2533_s12 + $0x17f0] sm:$0xff] }
 0x1f3   : > { %1822 = vmatpush1.msra.mxu0 %v644_v45  ;;  %1893 = vmatpush1.msra.mxu1 %v900_v23  ;;  %v549_v33 = vld [vmem:[%s2533_s12 + $0x838] sm:$0xff]  ;;  %v788_v42 = vld [vmem:[%s2533_s12 + $0xfb0] sm:$0xff] }
 0x1f4   : > { %1823 = vmatprep.subr.mxu0 %v637_v46  ;;  %1894 = vmatprep.subr.mxu1 %v893_v47  ;;  %v805_v34 = vld [vmem:[%s2533_s12 + $0x1038] sm:$0xff]  ;;  %v1044_v43 = vld [vmem:[%s2533_s12 + $0x17b0] sm:$0xff] }
 0x1f5   : > { %1824 = vmatpush1.msra.mxu0 %v636_v48  ;;  %1895 = vmatpush1.msra.mxu1 %v892_v50  ;;  %v797_v37 = vld [vmem:[%s2533_s12 + $0xff8] sm:$0xff]  ;;  %v780_v45 = vld [vmem:[%s2533_s12 + $0xf70] sm:$0xff] }
 0x1f6   : > { %1825 = vmatprep.subr.mxu0 %v629_v51  ;;  %1896 = vmatprep.subr.mxu1 %v885_v52  ;;  %v1053_v38 = vld [vmem:[%s2533_s12 + $0x17f8] sm:$0xff]  ;;  %v1036_v23 = vld [vmem:[%s2533_s12 + $0x1770] sm:$0xff] }
 0x1f7   : > { %1826 = vmatpush1.msra.mxu0 %v628_v53  ;;  %1897 = vmatpush1.msra.mxu1 %v884_v54  ;;  %v789_v15 = vld [vmem:[%s2533_s12 + $0xfb8] sm:$0xff]  ;;  %v772_v48 = vld [vmem:[%s2533_s12 + $0xf30] sm:$0xff] }
 0x1f8   : > { %1827 = vmatprep.subr.mxu0 %v621_v55  ;;  %1898 = vmatprep.subr.mxu1 %v877_v56  ;;  %v1045_v41 = vld [vmem:[%s2533_s12 + $0x17b8] sm:$0xff]  ;;  %v1028_v50 = vld [vmem:[%s2533_s12 + $0x1730] sm:$0xff] }
 0x1f9   : > { %1828 = vmatpush1.msra.mxu0 %v620_v57  ;;  %1899 = vmatpush1.msra.mxu1 %v876_v58  ;;  %v781_v19 = vld [vmem:[%s2533_s12 + $0xf78] sm:$0xff]  ;;  %v764_v53 = vld [vmem:[%s2533_s12 + $0xef0] sm:$0xff] }
 0x1fa   : > { %1829 = vmatprep.subr.mxu0 %v613_v59  ;;  %1900 = vmatprep.subr.mxu1 %v869_v60  ;;  %v1037_v44 = vld [vmem:[%s2533_s12 + $0x1778] sm:$0xff]  ;;  %v1020_v54 = vld [vmem:[%s2533_s12 + $0x16f0] sm:$0xff] }
 0x1fb   : > { %1830 = vmatpush1.msra.mxu0 %v612_v61  ;;  %1901 = vmatpush1.msra.mxu1 %v868_v62  ;;  %v773_v46 = vld [vmem:[%s2533_s12 + $0xf38] sm:$0xff]  ;;  %v756_v57 = vld [vmem:[%s2533_s12 + $0xeb0] sm:$0xff] }
 0x1fc   : > { %1831 = vmatprep.subr.mxu0 %v605_v63  ;;  %1902 = vmatprep.subr.mxu1 %v861_v0  ;;  %v1029_v47 = vld [vmem:[%s2533_s12 + $0x1738] sm:$0xff]  ;;  %v1012_v58 = vld [vmem:[%s2533_s12 + $0x16b0] sm:$0xff] }
 0x1fd   : > { %1832 = vmatpush1.msra.mxu0 %v604_v1  ;;  %1903 = vmatpush1.msra.mxu1 %v860_v2  ;;  %v765_v51 = vld [vmem:[%s2533_s12 + $0xef8] sm:$0xff]  ;;  %v748_v61 = vld [vmem:[%s2533_s12 + $0xe70] sm:$0xff] }
 0x1fe   : > { %1833 = vmatprep.subr.mxu0 %v597_v3  ;;  %1904 = vmatprep.subr.mxu1 %v853_v4  ;;  %v1021_v52 = vld [vmem:[%s2533_s12 + $0x16f8] sm:$0xff]  ;;  %v1004_v62 = vld [vmem:[%s2533_s12 + $0x1670] sm:$0xff] }
 0x1ff   : > { %1834 = vmatpush1.msra.mxu0 %v596_v5  ;;  %1905 = vmatpush1.msra.mxu1 %v852_v6  ;;  %v757_v55 = vld [vmem:[%s2533_s12 + $0xeb8] sm:$0xff]  ;;  %v740_v1 = vld [vmem:[%s2533_s12 + $0xe30] sm:$0xff] }
 0x200   : > { %1835 = vmatprep.subr.mxu0 %v589_v7  ;;  %1906 = vmatprep.subr.mxu1 %v845_v9  ;;  %v1013_v56 = vld [vmem:[%s2533_s12 + $0x16b8] sm:$0xff]  ;;  %v996_v2 = vld [vmem:[%s2533_s12 + $0x1630] sm:$0xff] }
 0x201   : > { %1836 = vmatpush1.msra.mxu0 %v588_v10  ;;  %1907 = vmatpush1.msra.mxu1 %v844_v11  ;;  %v749_v59 = vld [vmem:[%s2533_s12 + $0xe78] sm:$0xff]  ;;  %v732_v5 = vld [vmem:[%s2533_s12 + $0xdf0] sm:$0xff] }
 0x202   : > { %1837 = vmatprep.subr.mxu0 %v581_v12  ;;  %1908 = vmatprep.subr.mxu1 %v837_v18  ;;  %v1005_v60 = vld [vmem:[%s2533_s12 + $0x1678] sm:$0xff]  ;;  %v988_v6 = vld [vmem:[%s2533_s12 + $0x15f0] sm:$0xff]  ;;  %v1066_v12 = vsub.s32 2, %v2672_v8 }
 0x203   : > { %1838 = vmatpush1.msra.mxu0 %v580_v13  ;;  %1909 = vmatpush1.msra.mxu1 %v836_v14  ;;  %v741_v63 = vld [vmem:[%s2533_s12 + $0xe38] sm:$0xff]  ;;  %v724_v10 = vld [vmem:[%s2533_s12 + $0xdb0] sm:$0xff] }
 0x204   : > { %1839 = vmatprep.subr.mxu0 %v573_v20  ;;  %1910 = vmatprep.subr.mxu1 %v829_v21  ;;  %v997_v0 = vld [vmem:[%s2533_s12 + $0x1638] sm:$0xff]  ;;  %v980_v11 = vld [vmem:[%s2533_s12 + $0x15b0] sm:$0xff]  ;;  %v1070_v21 = vsub.s32 3, %v2672_v8 }
 0x205   : > { %1840 = vmatpush1.msra.mxu0 %v572_v22  ;;  %1911 = vmatpush1.msra.mxu1 %v828_v24  ;;  %v733_v3 = vld [vmem:[%s2533_s12 + $0xdf8] sm:$0xff]  ;;  %v716_v14 = vld [vmem:[%s2533_s12 + $0xd70] sm:$0xff] }
 0x206   : > { %1841 = vmatprep.subr.mxu0 %v565_v25  ;;  %1912 = vmatprep.subr.mxu1 %v821_v26  ;;  %v989_v4 = vld [vmem:[%s2533_s12 + $0x15f8] sm:$0xff]  ;;  %v972_v20 = vld [vmem:[%s2533_s12 + $0x1570] sm:$0xff]  ;;  %v1384_v25 = vpop.f32.mrf.mxu1 }
 0x207   : > { %1842 = vmatpush1.msra.mxu0 %v564_v27  ;;  %1913 = vmatpush1.msra.mxu1 %v820_v28  ;;  %v725_v7 = vld [vmem:[%s2533_s12 + $0xdb8] sm:$0xff]  ;;  %v708_v26 = vld [vmem:[%s2533_s12 + $0xd30] sm:$0xff]  ;;  %v1067_v28 = vrot.slane %v3198_v49, %v1066_v12 }
 0x208   : > { %1843 = vmatprep.subr.mxu0 %v557_v29  ;;  %1914 = vmatprep.subr.mxu1 %v813_v30  ;;  %v981_v9 = vld [vmem:[%s2533_s12 + $0x15b8] sm:$0xff]  ;;  %v964_v27 = vld [vmem:[%s2533_s12 + $0x1530] sm:$0xff] }
 0x209   : > { %1844 = vmatpush1.msra.mxu0 %v556_v31  ;;  %1915 = vmatpush1.msra.mxu1 %v812_v32  ;;  %v717_v18 = vld [vmem:[%s2533_s12 + $0xd78] sm:$0xff]  ;;  %v700_v31 = vld [vmem:[%s2533_s12 + $0xcf0] sm:$0xff] }
 0x20a   : > { %1845 = vmatprep.subr.mxu0 %v549_v33  ;;  %1916 = vmatprep.subr.mxu1 %v805_v34  ;;  %v973_v13 = vld [vmem:[%s2533_s12 + $0x1578] sm:$0xff]  ;;  %v956_v32 = vld [vmem:[%s2533_s12 + $0x14f0] sm:$0xff]  ;;  %v1071_v33 = vrot.slane %v3198_v49, %v1070_v21 }
 0x20b   : > { %1846 = vmatpush1.msra.mxu0 %v548_v35  ;;  %1917 = vmatpush1.msra.mxu1 %v804_v36  ;;  %v709_v22 = vld [vmem:[%s2533_s12 + $0xd38] sm:$0xff]  ;;  %v1386_v36 = vpop.f32.mrf.mxu1 }
 0x20c   : > { %1847 = vmatprep.subr.mxu0 %v797_v37  ;;  %1918 = vmatprep.subr.mxu1 %v1053_v38  ;;  %v965_v24 = vld [vmem:[%s2533_s12 + $0x1538] sm:$0xff]  ;;  %v692_v37 = vld [vmem:[%s2533_s12 + $0xcb0] sm:$0xff] }
 0x20d   : > { %1848 = vmatpush2.msra.mxu0 %v796_v39  ;;  %1919 = vmatpush2.msra.mxu1 %v1052_v40  ;;  %v701_v29 = vld [vmem:[%s2533_s12 + $0xcf8] sm:$0xff]  ;;  %v948_v38 = vld [vmem:[%s2533_s12 + $0x14b0] sm:$0xff]  ;;  %v1385_v39 = vadd.f32 %v1384_v25, %v1067_v28 }
 0x20e   : > { %1849 = vmatprep.subr.mxu0 %v789_v15  ;;  %1920 = vmatprep.subr.mxu1 %v1045_v41  ;;  %v957_v30 = vld [vmem:[%s2533_s12 + $0x14f8] sm:$0xff]  ;;  %v684_v41 = vld [vmem:[%s2533_s12 + $0xc70] sm:$0xff] }
 0x20f   : > { %1850 = vmatpush2.msra.mxu0 %v788_v42  ;;  %1921 = vmatpush2.msra.mxu1 %v1044_v43  ;;  %v693_v34 = vld [vmem:[%s2533_s12 + $0xcb8] sm:$0xff]  ;;  %v940_v42 = vld [vmem:[%s2533_s12 + $0x1470] sm:$0xff] }
 0x210   : > { %1851 = vmatprep.subr.mxu0 %v781_v19  ;;  %1922 = vmatprep.subr.mxu1 %v1037_v44  ;;  %v949_v35 = vld [vmem:[%s2533_s12 + $0x14b8] sm:$0xff]  ;;  %v1387_v44 = vadd.f32 %v1386_v36, %v1071_v33 }
 0x211   : > { %1852 = vmatpush2.msra.mxu0 %v780_v45  ;;  %1923 = vmatpush2.msra.mxu1 %v1036_v23  ;;  %v685_v40 = vld [vmem:[%s2533_s12 + $0xc78] sm:$0xff] }
 0x212   : > { %1853 = vmatprep.subr.mxu0 %v773_v46  ;;  %1924 = vmatprep.subr.mxu1 %v1029_v47  ;;  %v941_v15 = vld [vmem:[%s2533_s12 + $0x1478] sm:$0xff]  ;;  %v676_v47 = vld [vmem:[%s2533_s12 + $0xc30] sm:$0xff] }
 0x213   : > { %1854 = vmatpush2.msra.mxu0 %v772_v48  ;;  %1925 = vmatpush2.msra.mxu1 %v1028_v50  ;;  %v677_v45 = vld [vmem:[%s2533_s12 + $0xc38] sm:$0xff]  ;;  %v932_v48 = vld [vmem:[%s2533_s12 + $0x1430] sm:$0xff] }
 0x214   : > { %1855 = vmatprep.subr.mxu0 %v765_v51  ;;  %1926 = vmatprep.subr.mxu1 %v1021_v52  ;;  %v933_v23 = vld [vmem:[%s2533_s12 + $0x1438] sm:$0xff] }
 0x215   : > { %1856 = vmatpush2.msra.mxu0 %v764_v53  ;;  %1927 = vmatpush2.msra.mxu1 %v1020_v54 }
 0x216   : > { %1857 = vmatprep.subr.mxu0 %v757_v55  ;;  %1928 = vmatprep.subr.mxu1 %v1013_v56  ;;  %v1074_v56 = vsub.s32 4, %v2672_v8 }
 0x217   : > { %1858 = vmatpush2.msra.mxu0 %v756_v57  ;;  %1929 = vmatpush2.msra.mxu1 %v1012_v58  ;;  %v1078_v57 = vsub.s32 5, %v2672_v8 }
 0x218   : > { %1859 = vmatprep.subr.mxu0 %v749_v59  ;;  %1930 = vmatprep.subr.mxu1 %v1005_v60  ;;  %v1075_v59 = vrot.slane %v3198_v49, %v1074_v56 }
 0x219   : > { %1860 = vmatpush2.msra.mxu0 %v748_v61  ;;  %1931 = vmatpush2.msra.mxu1 %v1004_v62  ;;  %v1079_v60 = vrot.slane %v3198_v49, %v1078_v57 }
 0x21a   : > { %1861 = vmatprep.subr.mxu0 %v741_v63  ;;  %1932 = vmatprep.subr.mxu1 %v997_v0 }
 0x21b   : > { %1862 = vmatpush2.msra.mxu0 %v740_v1  ;;  %1933 = vmatpush2.msra.mxu1 %v996_v2 }
 0x21c   : > { %1863 = vmatprep.subr.mxu0 %v733_v3  ;;  %1934 = vmatprep.subr.mxu1 %v989_v4 }
 0x21d   : > { %1864 = vmatpush2.msra.mxu0 %v732_v5  ;;  %1935 = vmatpush2.msra.mxu1 %v988_v6 }
 0x21e   : > { %1865 = vmatprep.subr.mxu0 %v725_v7  ;;  %1936 = vmatprep.subr.mxu1 %v981_v9  ;;  %v1082_v7 = vsub.s32 6, %v2672_v8  ;;  %v1086_v9 = vsub.s32 7, %v2672_v8 }
 0x21f   : > { %1866 = vmatpush2.msra.mxu0 %v724_v10  ;;  %1937 = vmatpush2.msra.mxu1 %v980_v11 }
 0x220   : > { %1867 = vmatprep.subr.mxu0 %v717_v18  ;;  %1938 = vmatprep.subr.mxu1 %v973_v13  ;;  %v1083_v11 = vrot.slane %v3198_v49, %v1082_v7  ;;  %v1087_v12 = vrot.slane %v3198_v49, %v1086_v9 }
 0x221   : > { %1868 = vmatpush2.msra.mxu0 %v716_v14  ;;  %1939 = vmatpush2.msra.mxu1 %v972_v20 }
 0x222   : > { %1869 = vmatprep.subr.mxu0 %v709_v22  ;;  %1940 = vmatprep.subr.mxu1 %v965_v24 }
 0x223   : > { %1870 = vmatpush2.msra.mxu0 %v708_v26  ;;  %1941 = vmatpush2.msra.mxu1 %v964_v27 }
 0x224   : > { %1871 = vmatprep.subr.mxu0 %v701_v29  ;;  %1942 = vmatprep.subr.mxu1 %v957_v30 }
 0x225   : > { %1872 = vmatpush2.msra.mxu0 %v700_v31  ;;  %1943 = vmatpush2.msra.mxu1 %v956_v32 }
 0x226   : > { %1873 = vmatprep.subr.mxu0 %v693_v34  ;;  %1944 = vmatprep.subr.mxu1 %v949_v35  ;;  %v1455_v43 = vpop.f32.mrf.mxu0  ;;  %v1526_v19 = vpop.f32.mrf.mxu1 }
 0x227   : > { %1874 = vmatpush2.msra.mxu0 %v692_v37  ;;  %1945 = vmatpush2.msra.mxu1 %v948_v38  ;;  %v1456_v46 = vadd.f32 %v1455_v43, %v1385_v39 }
 0x228   : > { %1875 = vmatprep.subr.mxu0 %v685_v40  ;;  %1946 = vmatprep.subr.mxu1 %v941_v15  ;;  %v1457_v50 = vpop.f32.mrf.mxu0  ;;  %v1528_v52 = vpop.f32.mrf.mxu1 }
 0x229   : > { %1876 = vmatpush2.msra.mxu0 %v684_v41  ;;  %1947 = vmatpush2.msra.mxu1 %v940_v42  ;;  %v1458_v51 = vadd.f32 %v1457_v50, %v1387_v44  ;;  %v1527_v53 = vadd.f32 %v1526_v19, %v1456_v46 }
 0x22a   : > { %1877 = vmatprep.subr.mxu0 %v677_v45  ;;  %1948 = vmatprep.subr.mxu1 %v933_v23 }
 0x22b   : > { %1878 = vmatpush2.msra.mxu0 %v676_v47  ;;  %1949 = vmatpush2.msra.mxu1 %v932_v48  ;;  %v1529_v54 = vadd.f32 %v1528_v52, %v1458_v51 }
 0x22c   : > { %1880 = vmatmul.mubr.f32.vlgmr.msra.gmra.mxu0 %v2677_v16  ;;  %1951 = vmatmul.mubr.f32.vlgmr.msra.gmra.mxu1 %v2679_v17 }
 0x22d   : > { %v1966_v55 = vcombine.low %v1527_v53, %v1529_v54 }
 0x22f   : > { %1974 = vst [vmem:[%s3235_s13 + $0x8] sm:$0xff] %v1966_v55 }
 0x268   : > { %v1597_v58 = vpop.f32.mrf.mxu0  ;;  %v1668_v62 = vpop.f32.mrf.mxu1 }
 0x269   : > { %v1598_v63 = vadd.f32 %v1597_v58, %v1075_v59 }
 0x26a   : > { %v1599_v61 = vpop.f32.mrf.mxu0  ;;  %v1670_v1 = vpop.f32.mrf.mxu1 }
 0x26b   : > { %v1600_v0 = vadd.f32 %v1599_v61, %v1079_v60  ;;  %v1669_v2 = vadd.f32 %v1668_v62, %v1598_v63 }
 0x26d   : > { %v1671_v17 = vadd.f32 %v1670_v1, %v1600_v0 }
 0x2aa   : > { %v1739_v16 = vpop.f32.mrf.mxu0  ;;  %v1810_v10 = vpop.f32.mrf.mxu1 }
 0x2ab   : > { %v1740_v4 = vadd.f32 %v1739_v16, %v1669_v2  ;;  %v1811_v13 = vadd.f32 %v1810_v10, %v1083_v11 }
 0x2ac   : > { %v1741_v3 = vpop.f32.mrf.mxu0  ;;  %v1812_v18 = vpop.f32.mrf.mxu1 }
 0x2ad   : > { %v1742_v5 = vadd.f32 %v1741_v3, %v1671_v17  ;;  %v1813_v21 = vadd.f32 %v1812_v18, %v1087_v12 }
 0x2af   : > { %v1967_v6 = vcombine.low %v1740_v4, %v1742_v5 }
 0x2b1   : > { %1975 = vst [vmem:[%s3235_s13 + $0x10] sm:$0xff] %v1967_v6 }
 0x2ec   : > { %v1881_v14 = vpop.f32.mrf.mxu0  ;;  %v1952_v20 = vpop.f32.mrf.mxu1 }
 0x2ed   : > { %v1882_v22 = vadd.f32 %v1881_v14, %v1811_v13 }
 0x2ee   : > { %v1883_v24 = vpop.f32.mrf.mxu0  ;;  %v1954_v26 = vpop.f32.mrf.mxu1 }
 0x2ef   : > { %v1884_v25 = vadd.f32 %v1883_v24, %v1813_v21  ;;  %v1953_v8 = vadd.f32 %v1952_v20, %v1882_v22 }
 0x2f1   : > { %v1955_v27 = vadd.f32 %v1954_v26, %v1884_v25 }
 0x2f3   : > { %v1968_v28 = vcombine.low %v1953_v8, %v1955_v27 }
 0x2f5   : > { %1976 = vst [vmem:[%s3235_s13 + $0x18] sm:$0xff] %v1968_v28 }
 0x2f6   : > { %2280 = shalt.err (!%p2277_p1)
}
 0x2f7   : > { %s2281_s12 = scalar_lea.hbm %s1990_s26, 512  ;;  %s2285_s9 = scalar_lea.hbm %s3421_s4, 1024 }
 0x2f8   : > { %p2282_p7 = scmp.ne.s32.totalorder %s1990_s26, %s2281_s12  ;;  %p2286_p3 = scmp.lt.s32.totalorder %s1990_s26, %s3421_s4 }
 0x2f9   : > { %p2287_p4 = scmp.lt.s32.totalorder %s2285_s9, %s2281_s12 }
 0x2fa   : > { %p2283_p11 = pnand %p2282_p7, %p3435_p5 }
 0x2fb   : > { %p2288_p6 = por %p2287_p4, %p2286_p3 }
 0x2fc   : > { %p2284_p8 = pneg %p2283_p11 }
 0x2fe   : > { %p2289_p9 = pnand %p2288_p6, %p2284_p8 }
 0x300   : > { %2292 = shalt.err (!%p2289_p9)
}
 0x301   : > { %2125 = dma.vmem_to_hbm [thread:$0]  (%p3435_p5), %s1993_s21, 512, %s1990_s26, %s1978_s24  }
 0x302 PF: > { %s2004_s25 = sand.u32 1, %s2323_s15   ;;  %p3436_p12 = scmp.ne.s32.totalorder %s3429_s6, 0 }
 0x303   : > { %p3437_p0 = scmp.ge.s32.totalorder %s2335_s18, 2  ;;  %s2005_s13 = scalar_lea.sflag [#allocation4], %s2004_s25 }
 0x305   : > { %p2139_p10 = pnand %p3437_p0, %p3436_p12 }
 0x307   : > { %p2140_p2 = pneg %p2139_p10 }
 0x309   : > { %2318 = dma.done.wait (%p2140_p2), %s2005_s13, 512  }
 0x30a   : > { %2320 = vsyncadd (%p2140_p2), %s2005_s13, 4294966784  ;;  %p18_p13 = scmp.ge.s32.totalorder %s2392_s19, 4   ;;  %s3438_s15 = smov %s2327_s16 }
 0x30b   : > { %s3439_s16 = smov %s2331_s17  ;;  %s3440_s17 = smov %s2403_s22 }
 0x30c   : > { %s3441_s18 = smov %s2392_s19  ;;  %20 = sbr.rel (!%p18_p13) target bundleno = 6 (0x6), region = 97 }
 0x311   :  { %2010 = vsyncpa [#allocation3], 1 }
 0x312   :  { %2012 = vsyncpa [#allocation3 + $0x1], 1 }
 0x313   :  { %2013 = vsyncpa [#allocation6], 1 }
 0x314   :  { %2015 = vsyncpa [#allocation6 + $0x1], 1 }
 0x315   :  { %2016 = vsyncpa [#allocation4], 1 }
 0x316   :  { %2018 = vsyncpa [#allocation4 + $0x1], 1 }

</bundles_post_ra>
